<compile_context>
chip_gen: v5e
topology: v5e:2x2
jax: 0.10.0
libtpu: 0.0.40
codegen_flags: <defaults>
</compile_context>

<pallas_src>
import functools

import jax
import jax.numpy as jnp
import numpy as np
from jax.experimental import pallas as pl
from jax.experimental.pallas import tpu as pltpu

WIN = 5
PAD = WIN // 2
EPS = 1e-6  # GradMSE.eps

# Cap on H*W elements per batch-block so that double-buffered inputs plus the
# in-kernel padded/shifted temporaries stay well inside the default scoped
# VMEM on every TPU generation (v5e: 16 MiB, v6e/v7x: 32 MiB).
_MAX_BLOCK_HW_ELEMS = 64 * 1024


def _sobel_hv_np(window_size: int = WIN):
    """Replicates sobel_hv(window_size): returns (kernel_h, kernel_v) 5x5."""
    # torch.arange(-ws//2 + 1, ws//2 + 1) == arange(-2, 3) for ws=5
    r = np.arange(-(window_size // 2), window_size // 2 + 1, dtype=np.float32)
    h = np.broadcast_to(r[:, None], (window_size, window_size)).astype(np.float32)
    v = np.broadcast_to(r[None, :], (window_size, window_size)).astype(np.float32)
    denom = h * h + v * v + 1e-6
    return h / denom, v / denom


def _pad_edge_hw(x):
    """Replicate-pad the last two dims of x (..., H, W) by PAD on each side."""
    H, W = x.shape[-2], x.shape[-1]
    lead = x.shape[:-2]
    top = jnp.broadcast_to(x[..., 0:1, :], lead + (PAD, W))
    bot = jnp.broadcast_to(x[..., H - 1:H, :], lead + (PAD, W))
    xr = jnp.concatenate([top, x, bot], axis=-2)            # (..., H+2P, W)
    Hp = H + 2 * PAD
    left = jnp.broadcast_to(xr[..., :, 0:1], lead + (Hp, PAD))
    right = jnp.broadcast_to(xr[..., :, W - 1:W], lead + (Hp, PAD))
    return jnp.concatenate([left, xr, right], axis=-1)       # (..., H+2P, W+2P)


def _conv_sq(dp, kern, H, W):
    """(cross-correlate(dp, kern))**2 for padded difference dp: (bblk, Hp, Wp)."""
    partials = []
    for dj in range(WIN):
        wcol = [float(kern[di, dj]) for di in range(WIN)]
        if all(w == 0.0 for w in wcol):     # whole column of the kernel is zero
            continue
        # Lane-direction shift, hoisted out of the di loop (built once, reused
        # for every sublane offset).
        col = dp[:, :, dj:dj + W]                              # (bblk, Hp, W)
        part = None
        for di in range(WIN):
            w = wcol[di]
            if w == 0.0:                    # center row/col of sobel-hv is zero
                continue
            term = w * col[:, di:di + H, :]                    # sublane-only shift
            part = term if part is None else part + term
        partials.append(part)
    # Pairwise tree-sum of the independent per-dj chains (keeps VALU chains short).
    while len(partials) > 1:
        nxt = [partials[i] + partials[i + 1] for i in range(0, len(partials) - 1, 2)]
        if len(partials) % 2:
            nxt.append(partials[-1])
        partials = nxt
    g = partials[0]
    return g * g                              # mse_loss(..., reduction="none")


def _grad_mse_body(yhat_ref, tgt_ref, focus_ref, out_ref, *, bblk, H, W, kh, kv):
    """One grid step == bblk batch elements.

    yhat_ref / tgt_ref : (bblk, 2, H, W) unpadded VMEM tiles
    focus_ref          : (bblk, H, W) or None
    out_ref            : (1, 2) SMEM block -> (partial num, partial den)
    """
    # Conv is linear: filter the difference once (half the taps of the naive form).
    d = yhat_ref[...] - tgt_ref[...]                  # (bblk, 2, H, W)
    dp = _pad_edge_hw(d)                              # (bblk, 2, H+4, W+4) replicate pad
    # channel 0 -> horizontal kernel, channel 1 -> vertical kernel (groups=2)
    msge = _conv_sq(dp[:, 0], kh, H, W) + _conv_sq(dp[:, 1], kv, H, W)  # (bblk, H, W)

    if focus_ref is not None:
        f = focus_ref[...]                            # same focus for both channels
        num = jnp.sum(f * msge)
        den = 2.0 * jnp.sum(jnp.maximum(f, EPS))
    else:
        # focus == ones -> clamp_min(1, eps) == 1
        num = jnp.sum(msge)
        den = jnp.asarray(2.0 * bblk * H * W, dtype=jnp.float32)

    out_ref[0, 0] = num
    out_ref[0, 1] = den


def grad_mse_loss(yhat, target, target_inst=None):
    """Forward pass of GradMSE. Returns a scalar float32 loss."""
    B, C, H, W = yhat.shape
    assert C == 2, "HoVer maps must have 2 channels"
    yhat = yhat.astype(jnp.float32)
    target = target.astype(jnp.float32)

    # Batch-block size: largest divisor of B under a VMEM-friendly element cap.
    limit = max(1, _MAX_BLOCK_HW_ELEMS // (H * W))
    bblk = max(dv for dv in range(1, B + 1) if B % dv == 0 and dv <= limit)
    nb = B // bblk
    # TODO(synk): for very large single images (H*W >> cap, forcing bblk=1) tile H
    # with a 4-row halo instead of taking the whole image as one block.

    kh, kv = _sobel_hv_np(WIN)
    body = functools.partial(_grad_mse_body, bblk=bblk, H=H, W=W, kh=kh, kv=kv)

    in_specs = [
        pl.BlockSpec((bblk, 2, H, W), lambda b: (b, 0, 0, 0)),
        pl.BlockSpec((bblk, 2, H, W), lambda b: (b, 0, 0, 0)),
    ]
    args = [yhat, target]

    if target_inst is not None:
        # Single-channel focus map; broadcast across the 2 channels inside the kernel.
        in_specs.append(pl.BlockSpec((bblk, H, W), lambda b: (b, 0, 0)))
        args.append(target_inst.astype(jnp.float32))

        def kernel(yhat_ref, tgt_ref, focus_ref, out_ref):
            body(yhat_ref, tgt_ref, focus_ref, out_ref)
    else:
        def kernel(yhat_ref, tgt_ref, out_ref):
            body(yhat_ref, tgt_ref, None, out_ref)

    partials = pl.pallas_call(
        kernel,
        out_shape=jax.ShapeDtypeStruct((nb, 2), jnp.float32),
        grid_spec=pltpu.PrefetchScalarGridSpec(
            num_scalar_prefetch=0,
            grid=(nb,),
            in_specs=in_specs,
            out_specs=pl.BlockSpec((1, 2), lambda b: (b, 0),
                                   memory_space=pltpu.MemorySpace.SMEM),
        ),
        compiler_params=pltpu.CompilerParams(
            dimension_semantics=("parallel",)),
    )(*args)

    # Final reduction (and the single divide) in plain JAX.
    return jnp.sum(partials[:, 0]) / jnp.sum(partials[:, 1])


def _reference(yhat, target, target_inst=None):
    """Pure-JAX reference reproducing the PyTorch forward (dual-conv form)."""
    kh, kv = _sobel_hv_np(WIN)
    kern = np.stack([kh, kv])  # (2, 5, 5)

    def filt(x):
        B, C, H, W = x.shape
        xp = jnp.pad(x, ((0, 0), (0, 0), (PAD, PAD), (PAD, PAD)), mode="edge")
        out = jnp.zeros_like(x)
        for di in range(WIN):
            for dj in range(WIN):
                w = kern[None, :, di, dj, None, None]
                out = out + w * xp[:, :, di:di + H, dj:dj + W]
        return out

    msge = (filt(yhat) - filt(target)) ** 2
    if target_inst is not None:
        focus = jnp.stack([target_inst, target_inst], axis=1).astype(jnp.float32)
    else:
        focus = jnp.ones_like(target)
    return jnp.sum(focus * msge) / jnp.sum(jnp.maximum(focus, EPS))


if __name__ == "__main__":
    key = jax.random.PRNGKey(0)
    k1, k2, k3 = jax.random.split(key, 3)
    B, C, H, W = 2, 2, 16, 16

    yhat = jax.random.normal(k1, (B, C, H, W), dtype=jnp.float32)
    target = jax.random.normal(k2, (B, C, H, W), dtype=jnp.float32)
    target_inst = (jax.random.uniform(k3, (B, H, W)) > 0.5).astype(jnp.float32)

    # with focus (target_inst) path
    loss = jax.block_until_ready(grad_mse_loss(yhat, target, target_inst))
    ref = _reference(yhat, target, target_inst)
    assert jnp.allclose(loss, ref, rtol=1e-4, atol=1e-5), (loss, ref)

    # target_inst=None path (focus = ones)
    loss2 = jax.block_until_ready(grad_mse_loss(yhat, target, None))
    ref2 = _reference(yhat, target, None)
    assert jnp.allclose(loss2, ref2, rtol=1e-4, atol=1e-5), (loss2, ref2)

    print("KERNEL_OK")
</pallas_src>

<mosaic_0001>
module attributes {stable_mosaic.version = 11 : i64} {
  func.func @kernel(%arg0: i32, %arg1: memref<2x2x16x16xf32, #tpu.memory_space<vmem>>, %arg2: memref<2x2x16x16xf32, #tpu.memory_space<vmem>>, %arg3: memref<2x16x16xf32, #tpu.memory_space<vmem>>, %arg4: memref<1x2xf32, #tpu.memory_space<smem>>) attributes {dimension_semantics = [#tpu.dimension_semantics<parallel>], iteration_bounds = array<i64: 1>, scalar_prefetch = 0 : i64, scratch_operands = 0 : i64, tpu.core_type = #tpu.core_type<tc>, window_params = [{transform_indices = @transform_0, window_bounds = array<i64: 2, 2, 16, 16>}, {transform_indices = @transform_1, window_bounds = array<i64: 2, 2, 16, 16>}, {transform_indices = @transform_2, window_bounds = array<i64: 2, 16, 16>}, {transform_indices = @transform_3, window_bounds = array<i64: 1, 2>}]} {
    %c0 = arith.constant 0 : index
    %c0_0 = arith.constant 0 : index
    %c0_1 = arith.constant 0 : index
    %c0_2 = arith.constant 0 : index
    %0 = vector.load %arg1[%c0, %c0_0, %c0_1, %c0_2] : memref<2x2x16x16xf32, #tpu.memory_space<vmem>>, vector<2x2x16x16xf32>
    %c0_3 = arith.constant 0 : index
    %c0_4 = arith.constant 0 : index
    %c0_5 = arith.constant 0 : index
    %c0_6 = arith.constant 0 : index
    %1 = vector.load %arg2[%c0_3, %c0_4, %c0_5, %c0_6] : memref<2x2x16x16xf32, #tpu.memory_space<vmem>>, vector<2x2x16x16xf32>
    %2 = arith.subf %0, %1 : vector<2x2x16x16xf32>
    %3 = vector.extract_strided_slice %2 {offsets = [0, 0, 0, 0], sizes = [2, 2, 1, 16], strides = [1, 1, 1, 1]} : vector<2x2x16x16xf32> to vector<2x2x1x16xf32>
    %4 = vector.shape_cast %3 : vector<2x2x1x16xf32> to vector<2x2x1x16xf32>
    %5 = vector.broadcast %4 : vector<2x2x1x16xf32> to vector<2x2x2x16xf32>
    %6 = vector.extract_strided_slice %2 {offsets = [0, 0, 15, 0], sizes = [2, 2, 1, 16], strides = [1, 1, 1, 1]} : vector<2x2x16x16xf32> to vector<2x2x1x16xf32>
    %7 = vector.shape_cast %6 : vector<2x2x1x16xf32> to vector<2x2x1x16xf32>
    %8 = vector.broadcast %7 : vector<2x2x1x16xf32> to vector<2x2x2x16xf32>
    %9 = tpu.concatenate %5, %2, %8 in 2 : vector<2x2x2x16xf32>, vector<2x2x16x16xf32>, vector<2x2x2x16xf32> -> vector<2x2x20x16xf32>
    %10 = vector.extract_strided_slice %9 {offsets = [0, 0, 0, 0], sizes = [2, 2, 20, 1], strides = [1, 1, 1, 1]} : vector<2x2x20x16xf32> to vector<2x2x20x1xf32>
    %11 = vector.shape_cast %10 : vector<2x2x20x1xf32> to vector<2x2x20x1xf32>
    %12 = vector.broadcast %11 : vector<2x2x20x1xf32> to vector<2x2x20x2xf32>
    %13 = vector.extract_strided_slice %9 {offsets = [0, 0, 0, 15], sizes = [2, 2, 20, 1], strides = [1, 1, 1, 1]} : vector<2x2x20x16xf32> to vector<2x2x20x1xf32>
    %14 = vector.shape_cast %13 : vector<2x2x20x1xf32> to vector<2x2x20x1xf32>
    %15 = vector.broadcast %14 : vector<2x2x20x1xf32> to vector<2x2x20x2xf32>
    %16 = tpu.concatenate %12, %9, %15 in 3 : vector<2x2x20x2xf32>, vector<2x2x20x16xf32>, vector<2x2x20x2xf32> -> vector<2x2x20x20xf32>
    %17 = vector.extract_strided_slice %16 {offsets = [0, 0, 0, 0], sizes = [2, 1, 20, 20], strides = [1, 1, 1, 1]} : vector<2x2x20x20xf32> to vector<2x1x20x20xf32>
    %18 = vector.shape_cast %17 : vector<2x1x20x20xf32> to vector<2x20x20xf32>
    %19 = vector.extract_strided_slice %18 {offsets = [0, 0, 0], sizes = [2, 20, 16], strides = [1, 1, 1]} : vector<2x20x20xf32> to vector<2x20x16xf32>
    %20 = vector.extract_strided_slice %19 {offsets = [0, 0, 0], sizes = [2, 16, 16], strides = [1, 1, 1]} : vector<2x20x16xf32> to vector<2x16x16xf32>
    %cst = arith.constant -0.24999997 : f32
    %21 = vector.broadcast %cst : f32 to vector<2x16x16xf32>
    %22 = arith.mulf %21, %20 : vector<2x16x16xf32>
    %23 = vector.extract_strided_slice %19 {offsets = [0, 1, 0], sizes = [2, 16, 16], strides = [1, 1, 1]} : vector<2x20x16xf32> to vector<2x16x16xf32>
    %cst_7 = arith.constant -0.199999958 : f32
    %24 = vector.broadcast %cst_7 : f32 to vector<2x16x16xf32>
    %25 = arith.mulf %24, %23 : vector<2x16x16xf32>
    %26 = arith.addf %22, %25 : vector<2x16x16xf32>
    %27 = vector.extract_strided_slice %19 {offsets = [0, 3, 0], sizes = [2, 16, 16], strides = [1, 1, 1]} : vector<2x20x16xf32> to vector<2x16x16xf32>
    %cst_8 = arith.constant 0.199999958 : f32
    %28 = vector.broadcast %cst_8 : f32 to vector<2x16x16xf32>
    %29 = arith.mulf %28, %27 : vector<2x16x16xf32>
    %30 = arith.addf %26, %29 : vector<2x16x16xf32>
    %31 = vector.extract_strided_slice %19 {offsets = [0, 4, 0], sizes = [2, 16, 16], strides = [1, 1, 1]} : vector<2x20x16xf32> to vector<2x16x16xf32>
    %cst_9 = arith.constant 0.24999997 : f32
    %32 = vector.broadcast %cst_9 : f32 to vector<2x16x16xf32>
    %33 = arith.mulf %32, %31 : vector<2x16x16xf32>
    %34 = arith.addf %30, %33 : vector<2x16x16xf32>
    %35 = vector.extract_strided_slice %18 {offsets = [0, 0, 1], sizes = [2, 20, 16], strides = [1, 1, 1]} : vector<2x20x20xf32> to vector<2x20x16xf32>
    %36 = vector.extract_strided_slice %35 {offsets = [0, 0, 0], sizes = [2, 16, 16], strides = [1, 1, 1]} : vector<2x20x16xf32> to vector<2x16x16xf32>
    %cst_10 = arith.constant -0.399999917 : f32
    %37 = vector.broadcast %cst_10 : f32 to vector<2x16x16xf32>
    %38 = arith.mulf %37, %36 : vector<2x16x16xf32>
    %39 = vector.extract_strided_slice %35 {offsets = [0, 1, 0], sizes = [2, 16, 16], strides = [1, 1, 1]} : vector<2x20x16xf32> to vector<2x16x16xf32>
    %cst_11 = arith.constant -0.499999762 : f32
    %40 = vector.broadcast %cst_11 : f32 to vector<2x16x16xf32>
    %41 = arith.mulf %40, %39 : vector<2x16x16xf32>
    %42 = arith.addf %38, %41 : vector<2x16x16xf32>
    %43 = vector.extract_strided_slice %35 {offsets = [0, 3, 0], sizes = [2, 16, 16], strides = [1, 1, 1]} : vector<2x20x16xf32> to vector<2x16x16xf32>
    %cst_12 = arith.constant 0.499999762 : f32
    %44 = vector.broadcast %cst_12 : f32 to vector<2x16x16xf32>
    %45 = arith.mulf %44, %43 : vector<2x16x16xf32>
    %46 = arith.addf %42, %45 : vector<2x16x16xf32>
    %47 = vector.extract_strided_slice %35 {offsets = [0, 4, 0], sizes = [2, 16, 16], strides = [1, 1, 1]} : vector<2x20x16xf32> to vector<2x16x16xf32>
    %cst_13 = arith.constant 0.399999917 : f32
    %48 = vector.broadcast %cst_13 : f32 to vector<2x16x16xf32>
    %49 = arith.mulf %48, %47 : vector<2x16x16xf32>
    %50 = arith.addf %46, %49 : vector<2x16x16xf32>
    %51 = vector.extract_strided_slice %18 {offsets = [0, 0, 2], sizes = [2, 20, 16], strides = [1, 1, 1]} : vector<2x20x20xf32> to vector<2x20x16xf32>
    %52 = vector.extract_strided_slice %51 {offsets = [0, 0, 0], sizes = [2, 16, 16], strides = [1, 1, 1]} : vector<2x20x16xf32> to vector<2x16x16xf32>
    %cst_14 = arith.constant -0.499999881 : f32
    %53 = vector.broadcast %cst_14 : f32 to vector<2x16x16xf32>
    %54 = arith.mulf %53, %52 : vector<2x16x16xf32>
    %55 = vector.extract_strided_slice %51 {offsets = [0, 1, 0], sizes = [2, 16, 16], strides = [1, 1, 1]} : vector<2x20x16xf32> to vector<2x16x16xf32>
    %cst_15 = arith.constant -0.999999046 : f32
    %56 = vector.broadcast %cst_15 : f32 to vector<2x16x16xf32>
    %57 = arith.mulf %56, %55 : vector<2x16x16xf32>
    %58 = arith.addf %54, %57 : vector<2x16x16xf32>
    %59 = vector.extract_strided_slice %51 {offsets = [0, 3, 0], sizes = [2, 16, 16], strides = [1, 1, 1]} : vector<2x20x16xf32> to vector<2x16x16xf32>
    %cst_16 = arith.constant 0.999999046 : f32
    %60 = vector.broadcast %cst_16 : f32 to vector<2x16x16xf32>
    %61 = arith.mulf %60, %59 : vector<2x16x16xf32>
    %62 = arith.addf %58, %61 : vector<2x16x16xf32>
    %63 = vector.extract_strided_slice %51 {offsets = [0, 4, 0], sizes = [2, 16, 16], strides = [1, 1, 1]} : vector<2x20x16xf32> to vector<2x16x16xf32>
    %cst_17 = arith.constant 0.499999881 : f32
    %64 = vector.broadcast %cst_17 : f32 to vector<2x16x16xf32>
    %65 = arith.mulf %64, %63 : vector<2x16x16xf32>
    %66 = arith.addf %62, %65 : vector<2x16x16xf32>
    %67 = vector.extract_strided_slice %18 {offsets = [0, 0, 3], sizes = [2, 20, 16], strides = [1, 1, 1]} : vector<2x20x20xf32> to vector<2x20x16xf32>
    %68 = vector.extract_strided_slice %67 {offsets = [0, 0, 0], sizes = [2, 16, 16], strides = [1, 1, 1]} : vector<2x20x16xf32> to vector<2x16x16xf32>
    %cst_18 = arith.constant -0.399999917 : f32
    %69 = vector.broadcast %cst_18 : f32 to vector<2x16x16xf32>
    %70 = arith.mulf %69, %68 : vector<2x16x16xf32>
    %71 = vector.extract_strided_slice %67 {offsets = [0, 1, 0], sizes = [2, 16, 16], strides = [1, 1, 1]} : vector<2x20x16xf32> to vector<2x16x16xf32>
    %cst_19 = arith.constant -0.499999762 : f32
    %72 = vector.broadcast %cst_19 : f32 to vector<2x16x16xf32>
    %73 = arith.mulf %72, %71 : vector<2x16x16xf32>
    %74 = arith.addf %70, %73 : vector<2x16x16xf32>
    %75 = vector.extract_strided_slice %67 {offsets = [0, 3, 0], sizes = [2, 16, 16], strides = [1, 1, 1]} : vector<2x20x16xf32> to vector<2x16x16xf32>
    %cst_20 = arith.constant 0.499999762 : f32
    %76 = vector.broadcast %cst_20 : f32 to vector<2x16x16xf32>
    %77 = arith.mulf %76, %75 : vector<2x16x16xf32>
    %78 = arith.addf %74, %77 : vector<2x16x16xf32>
    %79 = vector.extract_strided_slice %67 {offsets = [0, 4, 0], sizes = [2, 16, 16], strides = [1, 1, 1]} : vector<2x20x16xf32> to vector<2x16x16xf32>
    %cst_21 = arith.constant 0.399999917 : f32
    %80 = vector.broadcast %cst_21 : f32 to vector<2x16x16xf32>
    %81 = arith.mulf %80, %79 : vector<2x16x16xf32>
    %82 = arith.addf %78, %81 : vector<2x16x16xf32>
    %83 = vector.extract_strided_slice %18 {offsets = [0, 0, 4], sizes = [2, 20, 16], strides = [1, 1, 1]} : vector<2x20x20xf32> to vector<2x20x16xf32>
    %84 = vector.extract_strided_slice %83 {offsets = [0, 0, 0], sizes = [2, 16, 16], strides = [1, 1, 1]} : vector<2x20x16xf32> to vector<2x16x16xf32>
    %cst_22 = arith.constant -0.24999997 : f32
    %85 = vector.broadcast %cst_22 : f32 to vector<2x16x16xf32>
    %86 = arith.mulf %85, %84 : vector<2x16x16xf32>
    %87 = vector.extract_strided_slice %83 {offsets = [0, 1, 0], sizes = [2, 16, 16], strides = [1, 1, 1]} : vector<2x20x16xf32> to vector<2x16x16xf32>
    %cst_23 = arith.constant -0.199999958 : f32
    %88 = vector.broadcast %cst_23 : f32 to vector<2x16x16xf32>
    %89 = arith.mulf %88, %87 : vector<2x16x16xf32>
    %90 = arith.addf %86, %89 : vector<2x16x16xf32>
    %91 = vector.extract_strided_slice %83 {offsets = [0, 3, 0], sizes = [2, 16, 16], strides = [1, 1, 1]} : vector<2x20x16xf32> to vector<2x16x16xf32>
    %cst_24 = arith.constant 0.199999958 : f32
    %92 = vector.broadcast %cst_24 : f32 to vector<2x16x16xf32>
    %93 = arith.mulf %92, %91 : vector<2x16x16xf32>
    %94 = arith.addf %90, %93 : vector<2x16x16xf32>
    %95 = vector.extract_strided_slice %83 {offsets = [0, 4, 0], sizes = [2, 16, 16], strides = [1, 1, 1]} : vector<2x20x16xf32> to vector<2x16x16xf32>
    %cst_25 = arith.constant 0.24999997 : f32
    %96 = vector.broadcast %cst_25 : f32 to vector<2x16x16xf32>
    %97 = arith.mulf %96, %95 : vector<2x16x16xf32>
    %98 = arith.addf %94, %97 : vector<2x16x16xf32>
    %99 = arith.addf %34, %50 : vector<2x16x16xf32>
    %100 = arith.addf %66, %82 : vector<2x16x16xf32>
    %101 = arith.addf %99, %100 : vector<2x16x16xf32>
    %102 = arith.addf %101, %98 : vector<2x16x16xf32>
    %103 = arith.mulf %102, %102 : vector<2x16x16xf32>
    %104 = vector.extract_strided_slice %16 {offsets = [0, 1, 0, 0], sizes = [2, 1, 20, 20], strides = [1, 1, 1, 1]} : vector<2x2x20x20xf32> to vector<2x1x20x20xf32>
    %105 = vector.shape_cast %104 : vector<2x1x20x20xf32> to vector<2x20x20xf32>
    %106 = vector.extract_strided_slice %105 {offsets = [0, 0, 0], sizes = [2, 20, 16], strides = [1, 1, 1]} : vector<2x20x20xf32> to vector<2x20x16xf32>
    %107 = vector.extract_strided_slice %106 {offsets = [0, 0, 0], sizes = [2, 16, 16], strides = [1, 1, 1]} : vector<2x20x16xf32> to vector<2x16x16xf32>
    %cst_26 = arith.constant -0.24999997 : f32
    %108 = vector.broadcast %cst_26 : f32 to vector<2x16x16xf32>
    %109 = arith.mulf %108, %107 : vector<2x16x16xf32>
    %110 = vector.extract_strided_slice %106 {offsets = [0, 1, 0], sizes = [2, 16, 16], strides = [1, 1, 1]} : vector<2x20x16xf32> to vector<2x16x16xf32>
    %cst_27 = arith.constant -0.399999917 : f32
    %111 = vector.broadcast %cst_27 : f32 to vector<2x16x16xf32>
    %112 = arith.mulf %111, %110 : vector<2x16x16xf32>
    %113 = arith.addf %109, %112 : vector<2x16x16xf32>
    %114 = vector.extract_strided_slice %106 {offsets = [0, 2, 0], sizes = [2, 16, 16], strides = [1, 1, 1]} : vector<2x20x16xf32> to vector<2x16x16xf32>
    %cst_28 = arith.constant -0.499999881 : f32
    %115 = vector.broadcast %cst_28 : f32 to vector<2x16x16xf32>
    %116 = arith.mulf %115, %114 : vector<2x16x16xf32>
    %117 = arith.addf %113, %116 : vector<2x16x16xf32>
    %118 = vector.extract_strided_slice %106 {offsets = [0, 3, 0], sizes = [2, 16, 16], strides = [1, 1, 1]} : vector<2x20x16xf32> to vector<2x16x16xf32>
    %cst_29 = arith.constant -0.399999917 : f32
    %119 = vector.broadcast %cst_29 : f32 to vector<2x16x16xf32>
    %120 = arith.mulf %119, %118 : vector<2x16x16xf32>
    %121 = arith.addf %117, %120 : vector<2x16x16xf32>
    %122 = vector.extract_strided_slice %106 {offsets = [0, 4, 0], sizes = [2, 16, 16], strides = [1, 1, 1]} : vector<2x20x16xf32> to vector<2x16x16xf32>
    %cst_30 = arith.constant -0.24999997 : f32
    %123 = vector.broadcast %cst_30 : f32 to vector<2x16x16xf32>
    %124 = arith.mulf %123, %122 : vector<2x16x16xf32>
    %125 = arith.addf %121, %124 : vector<2x16x16xf32>
    %126 = vector.extract_strided_slice %105 {offsets = [0, 0, 1], sizes = [2, 20, 16], strides = [1, 1, 1]} : vector<2x20x20xf32> to vector<2x20x16xf32>
    %127 = vector.extract_strided_slice %126 {offsets = [0, 0, 0], sizes = [2, 16, 16], strides = [1, 1, 1]} : vector<2x20x16xf32> to vector<2x16x16xf32>
    %cst_31 = arith.constant -0.199999958 : f32
    %128 = vector.broadcast %cst_31 : f32 to vector<2x16x16xf32>
    %129 = arith.mulf %128, %127 : vector<2x16x16xf32>
    %130 = vector.extract_strided_slice %126 {offsets = [0, 1, 0], sizes = [2, 16, 16], strides = [1, 1, 1]} : vector<2x20x16xf32> to vector<2x16x16xf32>
    %cst_32 = arith.constant -0.499999762 : f32
    %131 = vector.broadcast %cst_32 : f32 to vector<2x16x16xf32>
    %132 = arith.mulf %131, %130 : vector<2x16x16xf32>
    %133 = arith.addf %129, %132 : vector<2x16x16xf32>
    %134 = vector.extract_strided_slice %126 {offsets = [0, 2, 0], sizes = [2, 16, 16], strides = [1, 1, 1]} : vector<2x20x16xf32> to vector<2x16x16xf32>
    %cst_33 = arith.constant -0.999999046 : f32
    %135 = vector.broadcast %cst_33 : f32 to vector<2x16x16xf32>
    %136 = arith.mulf %135, %134 : vector<2x16x16xf32>
    %137 = arith.addf %133, %136 : vector<2x16x16xf32>
    %138 = vector.extract_strided_slice %126 {offsets = [0, 3, 0], sizes = [2, 16, 16], strides = [1, 1, 1]} : vector<2x20x16xf32> to vector<2x16x16xf32>
    %cst_34 = arith.constant -0.499999762 : f32
    %139 = vector.broadcast %cst_34 : f32 to vector<2x16x16xf32>
    %140 = arith.mulf %139, %138 : vector<2x16x16xf32>
    %141 = arith.addf %137, %140 : vector<2x16x16xf32>
    %142 = vector.extract_strided_slice %126 {offsets = [0, 4, 0], sizes = [2, 16, 16], strides = [1, 1, 1]} : vector<2x20x16xf32> to vector<2x16x16xf32>
    %cst_35 = arith.constant -0.199999958 : f32
    %143 = vector.broadcast %cst_35 : f32 to vector<2x16x16xf32>
    %144 = arith.mulf %143, %142 : vector<2x16x16xf32>
    %145 = arith.addf %141, %144 : vector<2x16x16xf32>
    %146 = vector.extract_strided_slice %105 {offsets = [0, 0, 3], sizes = [2, 20, 16], strides = [1, 1, 1]} : vector<2x20x20xf32> to vector<2x20x16xf32>
    %147 = vector.extract_strided_slice %146 {offsets = [0, 0, 0], sizes = [2, 16, 16], strides = [1, 1, 1]} : vector<2x20x16xf32> to vector<2x16x16xf32>
    %cst_36 = arith.constant 0.199999958 : f32
    %148 = vector.broadcast %cst_36 : f32 to vector<2x16x16xf32>
    %149 = arith.mulf %148, %147 : vector<2x16x16xf32>
    %150 = vector.extract_strided_slice %146 {offsets = [0, 1, 0], sizes = [2, 16, 16], strides = [1, 1, 1]} : vector<2x20x16xf32> to vector<2x16x16xf32>
    %cst_37 = arith.constant 0.499999762 : f32
    %151 = vector.broadcast %cst_37 : f32 to vector<2x16x16xf32>
    %152 = arith.mulf %151, %150 : vector<2x16x16xf32>
    %153 = arith.addf %149, %152 : vector<2x16x16xf32>
    %154 = vector.extract_strided_slice %146 {offsets = [0, 2, 0], sizes = [2, 16, 16], strides = [1, 1, 1]} : vector<2x20x16xf32> to vector<2x16x16xf32>
    %cst_38 = arith.constant 0.999999046 : f32
    %155 = vector.broadcast %cst_38 : f32 to vector<2x16x16xf32>
    %156 = arith.mulf %155, %154 : vector<2x16x16xf32>
    %157 = arith.addf %153, %156 : vector<2x16x16xf32>
    %158 = vector.extract_strided_slice %146 {offsets = [0, 3, 0], sizes = [2, 16, 16], strides = [1, 1, 1]} : vector<2x20x16xf32> to vector<2x16x16xf32>
    %cst_39 = arith.constant 0.499999762 : f32
    %159 = vector.broadcast %cst_39 : f32 to vector<2x16x16xf32>
    %160 = arith.mulf %159, %158 : vector<2x16x16xf32>
    %161 = arith.addf %157, %160 : vector<2x16x16xf32>
    %162 = vector.extract_strided_slice %146 {offsets = [0, 4, 0], sizes = [2, 16, 16], strides = [1, 1, 1]} : vector<2x20x16xf32> to vector<2x16x16xf32>
    %cst_40 = arith.constant 0.199999958 : f32
    %163 = vector.broadcast %cst_40 : f32 to vector<2x16x16xf32>
    %164 = arith.mulf %163, %162 : vector<2x16x16xf32>
    %165 = arith.addf %161, %164 : vector<2x16x16xf32>
    %166 = vector.extract_strided_slice %105 {offsets = [0, 0, 4], sizes = [2, 20, 16], strides = [1, 1, 1]} : vector<2x20x20xf32> to vector<2x20x16xf32>
    %167 = vector.extract_strided_slice %166 {offsets = [0, 0, 0], sizes = [2, 16, 16], strides = [1, 1, 1]} : vector<2x20x16xf32> to vector<2x16x16xf32>
    %cst_41 = arith.constant 0.24999997 : f32
    %168 = vector.broadcast %cst_41 : f32 to vector<2x16x16xf32>
    %169 = arith.mulf %168, %167 : vector<2x16x16xf32>
    %170 = vector.extract_strided_slice %166 {offsets = [0, 1, 0], sizes = [2, 16, 16], strides = [1, 1, 1]} : vector<2x20x16xf32> to vector<2x16x16xf32>
    %cst_42 = arith.constant 0.399999917 : f32
    %171 = vector.broadcast %cst_42 : f32 to vector<2x16x16xf32>
    %172 = arith.mulf %171, %170 : vector<2x16x16xf32>
    %173 = arith.addf %169, %172 : vector<2x16x16xf32>
    %174 = vector.extract_strided_slice %166 {offsets = [0, 2, 0], sizes = [2, 16, 16], strides = [1, 1, 1]} : vector<2x20x16xf32> to vector<2x16x16xf32>
    %cst_43 = arith.constant 0.499999881 : f32
    %175 = vector.broadcast %cst_43 : f32 to vector<2x16x16xf32>
    %176 = arith.mulf %175, %174 : vector<2x16x16xf32>
    %177 = arith.addf %173, %176 : vector<2x16x16xf32>
    %178 = vector.extract_strided_slice %166 {offsets = [0, 3, 0], sizes = [2, 16, 16], strides = [1, 1, 1]} : vector<2x20x16xf32> to vector<2x16x16xf32>
    %cst_44 = arith.constant 0.399999917 : f32
    %179 = vector.broadcast %cst_44 : f32 to vector<2x16x16xf32>
    %180 = arith.mulf %179, %178 : vector<2x16x16xf32>
    %181 = arith.addf %177, %180 : vector<2x16x16xf32>
    %182 = vector.extract_strided_slice %166 {offsets = [0, 4, 0], sizes = [2, 16, 16], strides = [1, 1, 1]} : vector<2x20x16xf32> to vector<2x16x16xf32>
    %cst_45 = arith.constant 0.24999997 : f32
    %183 = vector.broadcast %cst_45 : f32 to vector<2x16x16xf32>
    %184 = arith.mulf %183, %182 : vector<2x16x16xf32>
    %185 = arith.addf %181, %184 : vector<2x16x16xf32>
    %186 = arith.addf %125, %145 : vector<2x16x16xf32>
    %187 = arith.addf %165, %185 : vector<2x16x16xf32>
    %188 = arith.addf %186, %187 : vector<2x16x16xf32>
    %189 = arith.mulf %188, %188 : vector<2x16x16xf32>
    %190 = arith.addf %103, %189 : vector<2x16x16xf32>
    %c0_46 = arith.constant 0 : index
    %c0_47 = arith.constant 0 : index
    %c0_48 = arith.constant 0 : index
    %191 = vector.load %arg3[%c0_46, %c0_47, %c0_48] : memref<2x16x16xf32, #tpu.memory_space<vmem>>, vector<2x16x16xf32>
    %192 = arith.mulf %191, %190 : vector<2x16x16xf32>
    %193 = vector.shape_cast %192 : vector<2x16x16xf32> to vector<1x2x16x16xf32>
    %cst_49 = arith.constant dense<0.000000e+00> : vector<1xf32>
    %194 = vector.multi_reduction <add>, %193, %cst_49 [1, 2, 3] : vector<1x2x16x16xf32> to vector<1xf32>
    %195 = vector.shape_cast %194 : vector<1xf32> to vector<1x1x1x1xf32>
    %196 = vector.extract %195[0, 0, 0, 0] : f32 from vector<1x1x1x1xf32>
    %cst_50 = arith.constant 9.99999997E-7 : f32
    %197 = vector.broadcast %cst_50 : f32 to vector<2x16x16xf32>
    %198 = arith.maximumf %191, %197 : vector<2x16x16xf32>
    %199 = vector.shape_cast %198 : vector<2x16x16xf32> to vector<1x2x16x16xf32>
    %cst_51 = arith.constant dense<0.000000e+00> : vector<1xf32>
    %200 = vector.multi_reduction <add>, %199, %cst_51 [1, 2, 3] : vector<1x2x16x16xf32> to vector<1xf32>
    %201 = vector.shape_cast %200 : vector<1xf32> to vector<1x1x1x1xf32>
    %202 = vector.extract %201[0, 0, 0, 0] : f32 from vector<1x1x1x1xf32>
    %cst_52 = arith.constant 2.000000e+00 : f32
    %203 = arith.mulf %cst_52, %202 : f32
    %c0_53 = arith.constant 0 : index
    %c0_54 = arith.constant 0 : index
    %204 = memref.load %arg4[%c0_53, %c0_54] : memref<1x2xf32, #tpu.memory_space<smem>>
    memref.store %196, %arg4[%c0_53, %c0_54] : memref<1x2xf32, #tpu.memory_space<smem>>
    %c0_55 = arith.constant 0 : index
    %c1 = arith.constant 1 : index
    %205 = memref.load %arg4[%c0_55, %c1] : memref<1x2xf32, #tpu.memory_space<smem>>
    memref.store %203, %arg4[%c0_55, %c1] : memref<1x2xf32, #tpu.memory_space<smem>>
    return
  }
  func.func @transform_0(%arg0: i32) -> (i32, i32, i32, i32) {
    %c0_i32 = arith.constant 0 : i32
    %c0_i32_0 = arith.constant 0 : i32
    %c0_i32_1 = arith.constant 0 : i32
    %c0_i32_2 = arith.constant 0 : i32
    return %arg0, %c0_i32, %c0_i32_0, %c0_i32_1 : i32, i32, i32, i32
  }
  func.func @transform_1(%arg0: i32) -> (i32, i32, i32, i32) {
    %c0_i32 = arith.constant 0 : i32
    %c0_i32_0 = arith.constant 0 : i32
    %c0_i32_1 = arith.constant 0 : i32
    %c0_i32_2 = arith.constant 0 : i32
    return %arg0, %c0_i32, %c0_i32_0, %c0_i32_1 : i32, i32, i32, i32
  }
  func.func @transform_2(%arg0: i32) -> (i32, i32, i32) {
    %c0_i32 = arith.constant 0 : i32
    %c0_i32_0 = arith.constant 0 : i32
    %c0_i32_1 = arith.constant 0 : i32
    return %arg0, %c0_i32, %c0_i32_0 : i32, i32, i32
  }
  func.func @transform_3(%arg0: i32) -> (i32, i32) {
    %c0_i32 = arith.constant 0 : i32
    %c0_i32_0 = arith.constant 0 : i32
    return %arg0, %c0_i32 : i32, i32
  }
}

</mosaic_0001>

<bundles_post_ra>
// kernel: tpu_custom_call.1
= control target key start
LH: loop header
LB: loop body
LE: loop exit
PB: predicated region body
PF: predicated region fallthrough
CT: control target
= control target key end

     0   :  { %8 = vsyncpa [#allocation3], 0  ;;  %s2087_s0 = inlined_call_operand.hbm [shape: f32[2,2,16,16], index: 0, kind: input, shape index: {}]   ;;  %s2088_s1 = inlined_call_operand.hbm [shape: f32[2,2,16,16], index: 1, kind: input, shape index: {}]   ;;  %s2089_s2 = inlined_call_operand.hbm [shape: f32[2,16,16], index: 2, kind: input, shape index: {}]   ;;  %s2090_s3 = inlined_call_operand.hbm [shape: f32[1,2], index: 3, kind: output, shape index: {}]  }
   0x1   :  { %9 = vsyncpa [#allocation6], 0 }
   0x2   :  { %10 = vsyncpa [#allocation4], 0  ;;  %s28_s14 = sshll.u32 %s2088_s1, 4  ;;  %s1339_s15 = smov [#allocation5]   ;;  %s29_s14 = int_to_ptr.hbm [resolvable:$true] %s28_s14 }
   0x3   :  { %s30_s16 = sshll.u32 %s1339_s15, 4  ;;  %s15_s19 = sshll.u32 %s2087_s0, 4  ;;  %s31_s16 = int_to_ptr.vmem [resolvable:$true] %s30_s16  ;;  %s16_s19 = int_to_ptr.hbm [resolvable:$true] %s15_s19 }
   0x4   :  { %s1340_s20 = smov 128   ;;  %s1341_s21 = smov 8  }
   0x5   :  { %36 = dma.hbm_to_vmem [thread:$0]  %s29_s14, 1024, %s31_s16, [#allocation6], %s1340_s20, %s1340_s20, %s1341_s21  }
   0x6   :  { %s1342_s22 = smov [#allocation2]   ;;  %s41_s26 = sshll.u32 %s2089_s2, 4  ;;  %s42_s26 = int_to_ptr.hbm [resolvable:$true] %s41_s26 }
   0x7   :  { %s17_s23 = sshll.u32 %s1342_s22, 4  ;;  %s1343_s1 = smov [#allocation7]   ;;  %s18_s23 = int_to_ptr.vmem [resolvable:$true] %s17_s23 }
   0x8   :  { %23 = dma.hbm_to_vmem [thread:$0]  %s16_s19, 1024, %s18_s23, [#allocation3], %s1340_s20, %s1340_s20, %s1341_s21  }
   0x9   :  { %s43_s27 = sshll.u32 %s1343_s1, 4  ;;  %s44_s27 = int_to_ptr.vmem [resolvable:$true] %s43_s27 }
   0xa   :  { %49 = dma.hbm_to_vmem [thread:$0]  %s42_s26, 512, %s44_s27, [#allocation6], %s1340_s20, %s1340_s20, %s1341_s21  }
   0xb   :  { %1333 = dma.done.wait [#allocation3], 1024  }
   0xc   :  { %1334 = vsyncadd [#allocation3], 4294966272 }
   0xd   :  { %1335 = dma.done.wait [#allocation6], 1536  }
   0xe   :  { %1336 = vsyncadd [#allocation6], 4294965760  ;;  %v1344_v0 = vmov 0   ;;  %v64_v1 = vld [vmem:[#allocation2 + $0x10] sm:$0xff]  ;;  %v65_v2 = vld [vmem:[#allocation2 + $0x18] sm:$0xff]  ;;  %vm102_vm0 = vcmask 1041408  }
   0xf   :  { %1237 = vset.pattern.permute.xlu2 %v1344_v0  ;;  %1236 = vset.pattern.permute.xlu1 %v1344_v0  ;;  %v72_v3 = vld [vmem:[#allocation5 + $0x10] sm:$0xff]  ;;  %v73_v4 = vld [vmem:[#allocation5 + $0x18] sm:$0xff]  ;;  %v63_v6 = vld [vmem:[#allocation2 + $0x8] sm:$0xff]  ;;  %s1345_s0 = smov 2   ;;  %v1346_v27 = vmov 15   ;;  %vm271_vm1 = vcmask 15360  }
  0x10   :  { %1235 = vset.pattern.permute.xlu0 %v1344_v0  ;;  %v80_v5 = vsub.f32 %v64_v1, %v72_v3  ;;  %v71_v7 = vld [vmem:[#allocation5 + $0x8] sm:$0xff]  ;;  %v81_v8 = vsub.f32 %v65_v2, %v73_v4  ;;  %v62_v10 = vld [vmem:[#allocation2] sm:$0xff]  ;;  %v68_v28 = vld [vmem:[#allocation2 + $0x30] sm:$0xff]  ;;  %vm284_vm2 = vcmask 146432   ;;  %vm313_vm3 = vcmask 1046528   ;;  %s1347_s2 = smov 127  }
  0x11   :  { %v79_v9 = vsub.f32 %v63_v6, %v71_v7  ;;  %v70_v11 = vld [vmem:[#allocation5] sm:$0xff]  ;;  %v76_v29 = vld [vmem:[#allocation5 + $0x30] sm:$0xff]  ;;  %v67_v35 = vld [vmem:[#allocation2 + $0x28] sm:$0xff]  ;;  %vm344_vm4 = vcmask 1044480   ;;  %vm375_vm5 = vcmask 1043456   ;;  %vm696_vm6 = vcmask 1045504  }
  0x12   :  { %v106_v12 = vrot.slane %v80_v5, 6  ;;  %v78_v13 = vsub.f32 %v62_v10, %v70_v11  ;;  %v107_v14 = vrot.slane %v81_v8, 6  ;;  %v91_v22 = vperm.slane %v81_v8, 7  ;;  %v66_v34 = vld [vmem:[#allocation2 + $0x20] sm:$0xff]  ;;  %v75_v37 = vld [vmem:[#allocation5 + $0x28] sm:$0xff]  ;;  %v69_v43 = vld [vmem:[#allocation2 + $0x38] sm:$0xff] }
  0x13   :  { %v90_v15 = vperm.slane %v79_v9, 7  ;;  %v104_v16 = vrot.slane %v79_v9, 6  ;;  %v87_v23 = vperm.slane %v80_v5, 0  ;;  %v84_v30 = vsub.f32 %v68_v28, %v76_v29  ;;  %v74_v36 = vld [vmem:[#allocation5 + $0x20] sm:$0xff]  ;;  %v77_v44 = vld [vmem:[#allocation5 + $0x38] sm:$0xff]  ;;  %s1348_s28 = smov 124  }
  0x14   :  { %v86_v17 = vperm.slane %v78_v13, 0  ;;  %v103_v18 = vrot.slane %v78_v13, 6  ;;  %v108_v19 = vsel %vm102_vm0, %v106_v12, %v107_v14  ;;  %v128_v24 = vsel %vm102_vm0, %v107_v14, %v91_v22  ;;  %s1349_s29 = smov 126   ;;  %s1350_s30 = smov 125  }
  0x15   :  { %v127_v20 = vsel %vm102_vm0, %v104_v16, %v90_v15  ;;  %151 = vperm.xlu2 %1237, %v108_v19   ;;  %v124_v25 = vsel %vm102_vm0, %v87_v23, %v106_v12  ;;  %v89_v31 = vperm.slane %v84_v30, 0  ;;  %v112_v32 = vrot.slane %v84_v30, 6  ;;  %s1206_s6 = sshll.u32 %s2090_s3, 4  ;;  %s1351_s10 = smov [#allocation8]   ;;  %s1207_s6 = int_to_ptr.hbm [resolvable:$true] %s1206_s6 }
  0x16   :  { %142 = vperm.xlu1 %1236, %v127_v20   ;;  %v123_v21 = vsel %vm102_vm0, %v86_v17, %v103_v18  ;;  %v105_v26 = vsel %vm102_vm0, %v103_v18, %v104_v16  ;;  %v82_v38 = vsub.f32 %v66_v34, %v74_v36  ;;  %v83_v39 = vsub.f32 %v67_v35, %v75_v37 }
  0x17   :  { %133 = vperm.xlu0 %1235, %v123_v21   ;;  %v126_v33 = vsel %vm102_vm0, %v89_v31, %v112_v32  ;;  %v85_v47 = vsub.f32 %v69_v43, %v77_v44  ;;  %vm1159_vm7 = vcmask 130048  }
  0x18   :  { %v109_v40 = vrot.slane %v82_v38, 6  ;;  %v110_v41 = vrot.slane %v83_v39, 6  ;;  %v88_v42 = vperm.slane %v82_v38, 0  ;;  %v92_v52 = vperm.slane %v83_v39, 7 }
  0x19   :  { %v113_v48 = vrot.slane %v85_v47, 6  ;;  %v93_v50 = vperm.slane %v85_v47, 7 }
  0x1a   :  { %v111_v45 = vsel %vm102_vm0, %v109_v40, %v110_v41  ;;  %v125_v46 = vsel %vm102_vm0, %v88_v42, %v109_v40  ;;  %v129_v53 = vsel %vm102_vm0, %v110_v41, %v92_v52 }
  0x1b   :  { %v114_v49 = vsel %vm102_vm0, %v112_v32, %v113_v48  ;;  %v130_v51 = vsel %vm102_vm0, %v113_v48, %v93_v50 }
  0x1d   :  { %156 = vperm.xlu2 %1237, %v128_v24  }
  0x1e   :  { %147 = vperm.xlu1 %1236, %v124_v25  }
  0x1f   :  { %137 = vperm.xlu0 %1235, %v105_v26  }
  0x25   :  { %239 = vrot.lane.b32.xlu2 %v127_v20, %s1345_s0 }
  0x26   :  { %237 = vrot.lane.b32.xlu1 %v105_v26, %s1345_s0  ;;  %1239 = vset.pattern.permute.xlu2 %v1346_v27 }
  0x27   :  { %235 = vrot.lane.b32.xlu0 %v123_v21, %s1345_s0  ;;  %1238 = vset.pattern.permute.xlu1 %v1346_v27 }
  0x2d   :  { %245 = vrot.lane.b32.xlu2 %v128_v24, %s1345_s0 }
  0x2e   :  { %243 = vrot.lane.b32.xlu1 %v108_v19, %s1345_s0 }
  0x2f   :  { %241 = vrot.lane.b32.xlu0 %v124_v25, %s1345_s0 }
  0x35   :  { %196 = vperm.xlu2 %1239, %v127_v20  }
  0x36   :  { %192 = vperm.xlu1 %1238, %v105_v26  }
  0x37   :  { %175 = vperm.xlu0 %1235, %v126_v33  }
  0x3d   :  { %204 = vperm.xlu2 %1239, %v108_v19  }
  0x3e   :  { %200 = vperm.xlu1 %1238, %v124_v25  }
  0x3f   :  { %1242 = vset.pattern.permute.xlu0 %v1346_v27 }
  0x40   :  { %188 = vperm.xlu0 %1242, %v123_v21  }
  0x45   :  { %1241 = vset.pattern.permute.xlu2 %v1344_v0 }
  0x46   :  { %1240 = vset.pattern.permute.xlu1 %v1344_v0  ;;  %165 = vperm.xlu2 %1241, %v111_v45  }
  0x47   :  { %161 = vperm.xlu1 %1240, %v125_v46  }
  0x48   :  { %208 = vperm.xlu0 %1242, %v128_v24  }
  0x4e   :  { %247 = vrot.lane.b32.xlu2 %v125_v46, %s1345_s0 }
  0x4f   :  { %179 = vperm.xlu1 %1240, %v114_v49   ;;  %1244 = vset.pattern.permute.xlu2 %v1346_v27 }
  0x50   :  { %255 = vrot.lane.b32.xlu0 %v114_v49, %s1345_s0 }
  0x56   :  { %253 = vrot.lane.b32.xlu2 %v126_v33, %s1345_s0 }
  0x57   :  { %249 = vrot.lane.b32.xlu1 %v111_v45, %s1345_s0 }
  0x58   :  { %224 = vperm.xlu0 %1242, %v126_v33   ;;  %1243 = vset.pattern.permute.xlu1 %v1346_v27 }
  0x5e   :  { %216 = vperm.xlu2 %1244, %v111_v45  }
  0x5f   :  { %212 = vperm.xlu1 %1243, %v125_v46  }
  0x60   :  { %257 = vrot.lane.b32.xlu0 %v130_v51, %s1345_s0 }
  0x66   :  { %1245 = vset.pattern.permute.xlu2 %v1344_v0 }
  0x67   :  { %228 = vperm.xlu1 %1243, %v114_v49   ;;  %170 = vperm.xlu2 %1245, %v129_v53  }
  0x6f   :  { %1246 = vset.pattern.permute.xlu1 %v1344_v0  ;;  %v152_v54 = vpop.permute.xlu2 %151  ;;  %251 = vrot.lane.b32.xlu2 %v129_v53, %s1345_s0 }
  0x70   :  { %184 = vperm.xlu1 %1246, %v130_v51   ;;  %1248 = vset.pattern.permute.xlu2 %v1346_v27 }
  0x77   :  { %v1418_v55 = vpop.permute.xlu2 %156  ;;  %232 = vperm.xlu2 %1248, %v130_v51  }
  0x78   :  { %1247 = vset.pattern.permute.xlu1 %v1346_v27 }
  0x79   :  { %220 = vperm.xlu1 %1247, %v129_v53  }
  0x7f   :  { %v240_v56 = vpop.permute.xlu2 %239 }
  0x87   :  { %v1421_v58 = vpop.permute.xlu2 %245 }
  0x88   :  { %v143_v57 = vpop.permute.xlu1 %142 }
  0x89   :  { %v1423_v59 = vpop.permute.xlu0 %133  ;;  %v274_v2 = vsel %vm271_vm1, %v143_v57, %v240_v56 }
  0x8f   :  { %v197_v62 = vpop.permute.xlu2 %196 }
  0x90   :  { %v148_v60 = vpop.permute.xlu1 %147  ;;  %v1427_v4 = vsel %vm284_vm2, %v274_v2, %v197_v62 }
  0x91   :  { %v138_v61 = vpop.permute.xlu0 %137  ;;  %v400_v6 = vmul.f32 -0.49999976, %v1427_v4  ;;  %v430_v7 = vmul.f32 0.49999976, %v1427_v4  ;;  %v460_v8 = vmul.f32 0.39999992, %v1427_v4 }
  0x92   :  { %v303_v9 = vmul.f32 -0.19999996, %v1427_v4  ;;  %v334_v10 = vmul.f32 0.19999996, %v1427_v4  ;;  %v365_v11 = vmul.f32 0.24999997, %v1427_v4 }
  0x93   :  { %v413_v15 = vrot.slane %v400_v6, 1  ;;  %v443_v16 = vrot.slane %v430_v7, 3  ;;  %v473_v17 = vrot.slane %v460_v8, 4  ;;  %v494_v22 = vmul.f32 -0.99999905, %v1427_v4 }
  0x94   :  { %v317_v21 = vrot.slane %v303_v9, 1  ;;  %v348_v25 = vrot.slane %v334_v10, 3  ;;  %v379_v26 = vrot.slane %v365_v11, 4 }
  0x95   :  { %v507_v62 = vrot.slane %v494_v22, 1 }
  0x97   :  { %v205_v1 = vpop.permute.xlu2 %204 }
  0x98   :  { %v238_v63 = vpop.permute.xlu1 %237 }
  0x99   :  { %v236_v0 = vpop.permute.xlu0 %235  ;;  %v273_v13 = vsel %vm271_vm1, %v138_v61, %v238_v63 }
  0x9a   :  { %v272_v56 = vsel %vm271_vm1, %v1423_v59, %v236_v0 }
  0xa0   :  { %v244_v3 = vpop.permute.xlu1 %243  ;;  %v1435_v12 = vpop.permute.xlu2 %165 }
  0xa1   :  { %v242_v5 = vpop.permute.xlu0 %241  ;;  %v276_v18 = vsel %vm271_vm1, %v152_v54, %v244_v3 }
  0xa2   :  { %v1459_v30 = vsel %vm284_vm2, %v276_v18, %v205_v1  ;;  %v275_v42 = vsel %vm271_vm1, %v148_v60, %v242_v5 }
  0xa3   :  { %v1493_v54 = vmul.f32 0.39999992, %v1459_v30  ;;  %v1010_v11 = vmul.f32 0.49999988, %v1459_v30 }
  0xa5   :  { %v992_v8 = vrot.slane %v1493_v54, 1 }
  0xa8   :  { %v193_v14 = vpop.permute.xlu1 %192  ;;  %v1487_v51 = vpop.permute.xlu2 %247 }
  0xa9   :  { %v1440_v19 = vsel %vm284_vm2, %v273_v13, %v193_v14  ;;  %v1442_v20 = vpop.permute.xlu0 %175 }
  0xaa   :  { %v399_v23 = vmul.f32 -0.49999976, %v1440_v19  ;;  %v1447_v24 = vmul.f32 0.49999976, %v1440_v19  ;;  %v1450_v27 = vmul.f32 0.39999992, %v1440_v19 }
  0xab   :  { %v1453_v28 = vmul.f32 -0.19999996, %v1440_v19  ;;  %v1456_v29 = vmul.f32 0.19999996, %v1440_v19  ;;  %v1463_v33 = vmul.f32 0.24999997, %v1440_v19 }
  0xac   :  { %v411_v31 = vrot.slane %v399_v23, 1  ;;  %v441_v32 = vrot.slane %v1447_v24, 3  ;;  %v395_v34 = vmul.f32 -0.39999992, %v1440_v19  ;;  %v298_v37 = vmul.f32 -0.24999997, %v1440_v19 }
  0xad   :  { %v315_v35 = vrot.slane %v1453_v28, 1  ;;  %v346_v36 = vrot.slane %v1456_v29, 3  ;;  %v471_v39 = vrot.slane %v1450_v27, 4  ;;  %v2092_v40 = vrot.slane %v1463_v33, 4 }
  0xae   :  { %v414_v38 = vsel %vm313_vm3, %v411_v31, %v413_v15  ;;  %v1473_v41 = vmul.f32 -0.99999905, %v1440_v19  ;;  %v444_v47 = vsel %vm344_vm4, %v441_v32, %v443_v16  ;;  %v277_v24 = vsel %vm271_vm1, %v1418_v55, %v1421_v58 }
  0xaf   :  { %v425_v43 = vadd.f32 %v414_v38, %v395_v34  ;;  %v318_v44 = vsel %vm313_vm3, %v315_v35, %v317_v21  ;;  %v349_v45 = vsel %vm344_vm4, %v346_v36, %v348_v25  ;;  %v380_v49 = vsel %vm375_vm5, %v2092_v40, %v379_v26 }
  0xb0   :  { %v201_v46 = vpop.permute.xlu1 %200  ;;  %v329_v48 = vadd.f32 %v318_v44, %v298_v37  ;;  %v505_v50 = vrot.slane %v1473_v41, 1  ;;  %v474_v60 = vsel %vm375_vm5, %v471_v39, %v473_v17  ;;  %v1022_v27 = vrot.slane %v1010_v11, 2  ;;  %v1526_v37 = vpop.permute.xlu2 %253 }
  0xb1   :  { %v1490_v52 = vsel %vm284_vm2, %v275_v42, %v201_v46  ;;  %v455_v53 = vadd.f32 %v444_v47, %v425_v43  ;;  %v1040_v47 = vrot.slane %v1493_v54, 3 }
  0xb2   :  { %v189_v57 = vpop.permute.xlu0 %188  ;;  %v979_v61 = vmul.f32 0.39999992, %v1490_v52  ;;  %v360_v2 = vadd.f32 %v349_v45, %v329_v48  ;;  %v1009_v6 = vmul.f32 0.49999988, %v1490_v52  ;;  %v1508_v59 = vsel %vm313_vm3, %v505_v50, %v507_v62 }
  0xb3   :  { %v1500_v63 = vsel %vm284_vm2, %v272_v56, %v189_v57  ;;  %v485_v1 = vadd.f32 %v474_v60, %v455_v53  ;;  %v975_v14 = vmul.f32 0.24999997, %v1490_v52  ;;  %v1635_v29 = vmul.f32 -0.99999905, %v1490_v52 }
  0xb4   :  { %v398_v3 = vmul.f32 -0.49999976, %v1500_v63  ;;  %v428_v5 = vmul.f32 0.49999976, %v1500_v63  ;;  %v458_v0 = vmul.f32 0.39999992, %v1500_v63  ;;  %v1524_v34 = vadd.f32 %v380_v49, %v360_v2 }
  0xb5   :  { %588 = vrot.lane.b32.xlu1 %v485_v1, %s1347_s2  ;;  %v991_v7 = vrot.slane %v979_v61, 1  ;;  %v394_v13 = vmul.f32 -0.39999992, %v1500_v63  ;;  %v1021_v18 = vrot.slane %v1009_v6, 2  ;;  %v1039_v42 = vrot.slane %v979_v61, 3 }
  0xb6   :  { %v410_v9 = vrot.slane %v398_v3, 1  ;;  %v440_v10 = vrot.slane %v428_v5, 3  ;;  %v470_v17 = vrot.slane %v458_v0, 4  ;;  %v1065_v56 = vrot.slane %v975_v14, 4 }
  0xb7   :  { %v993_v15 = vsel %vm313_vm3, %v991_v7, %v992_v8  ;;  %v1023_v44 = vsel %vm696_vm6, %v1021_v18, %v1022_v27  ;;  %v524_v2 = vmul.f32 0.99999905, %v1427_v4  ;;  %v1546_v6 = vmul.f32 0.99999905, %v1440_v19 }
  0xb8   :  { %v412_v16 = vsel %vm313_vm3, %v410_v9, %v411_v31  ;;  %v1005_v23 = vadd.f32 %v993_v15, %v975_v14  ;;  %v442_v26 = vsel %vm344_vm4, %v440_v10, %v441_v32  ;;  %v472_v43 = vsel %vm375_vm5, %v470_v17, %v471_v39  ;;  %v217_v7 = vpop.permute.xlu2 %216 }
  0xb9   :  { %v1518_v21 = vpop.permute.xlu1 %161  ;;  %v424_v22 = vadd.f32 %v412_v16, %v394_v13  ;;  %v976_v32 = vmul.f32 0.24999997, %v1459_v30  ;;  %v1041_v39 = vsel %vm344_vm4, %v1039_v42, %v1040_v47  ;;  %v489_v10 = vmul.f32 -0.49999988, %v1440_v19 }
  0xba   :  { %v209_v25 = vpop.permute.xlu0 %208  ;;  %v1035_v46 = vadd.f32 %v1023_v44, %v1005_v23  ;;  %v1552_v14 = vmul.f32 0.49999988, %v1440_v19  ;;  %v554_v15 = vmul.f32 0.49999988, %v1427_v4  ;;  %v535_v18 = vrot.slane %v1546_v6, 3 }
  0xbb   :  { %v1529_v31 = vsel %vm284_vm2, %v277_v24, %v209_v25  ;;  %v454_v38 = vadd.f32 %v442_v26, %v424_v22  ;;  %v1066_v3 = vrot.slane %v976_v32, 4  ;;  %v519_v17 = vadd.f32 %v1508_v59, %v489_v10 }
  0xbc   :  { %v981_v45 = vmul.f32 0.39999992, %v1529_v31  ;;  %v1011_v55 = vmul.f32 0.49999988, %v1529_v31  ;;  %v1057_v53 = vmul.f32 0.24999997, %v1529_v31  ;;  %v1053_v62 = vadd.f32 %v1041_v39, %v1035_v46 }
  0xbd   :  { %v484_v58 = vadd.f32 %v472_v43, %v454_v38  ;;  %v1067_v9 = vsel %vm375_vm5, %v1065_v56, %v1066_v3  ;;  %v537_v22 = vrot.slane %v524_v2, 3  ;;  %v565_v4 = vrot.slane %v1552_v14, 4 }
  0xbe   :  { %v994_v48 = vrot.slane %v981_v45, 1  ;;  %v1024_v49 = vrot.slane %v1011_v55, 2  ;;  %v1042_v60 = vrot.slane %v981_v45, 3  ;;  %v1068_v5 = vrot.slane %v1057_v53, 4 }
  0xbf   :  { %586 = vrot.lane.b32.xlu0 %v484_v58, %s1347_s2  ;;  %v1079_v11 = vadd.f32 %v1067_v9, %v1053_v62  ;;  %v538_v25 = vsel %vm344_vm4, %v535_v18, %v537_v22  ;;  %v301_v38 = vmul.f32 -0.19999996, %v1500_v63  ;;  %v332_v43 = vmul.f32 0.19999996, %v1500_v63 }
  0xc0   :  { %v995_v57 = vsel %vm313_vm3, %v992_v8, %v994_v48  ;;  %v1025_v54 = vsel %vm696_vm6, %v1022_v27, %v1024_v49  ;;  %v1043_v8 = vsel %vm344_vm4, %v1040_v47, %v1042_v60  ;;  %v1069_v16 = vsel %vm375_vm5, %v1066_v3, %v1068_v5 }
  0xc1   :  { %v1541_v61 = vpop.permute.xlu1 %179  ;;  %v1006_v1 = vadd.f32 %v995_v57, %v976_v32  ;;  %v549_v26 = vadd.f32 %v538_v25, %v519_v17  ;;  %v567_v27 = vrot.slane %v554_v15, 4  ;;  %v1572_v44 = vmul.f32 -0.49999976, %v1459_v30  ;;  %v1574_v45 = vpop.permute.xlu2 %170 }
  0xc2   :  { %v256_v23 = vpop.permute.xlu0 %255  ;;  %v1577_v55 = vmul.f32 -0.99999905, %v1459_v30  ;;  %v314_v32 = vrot.slane %v301_v38, 1  ;;  %v345_v46 = vrot.slane %v332_v43, 3  ;;  %v1585_v47 = vmul.f32 -0.49999976, %v1490_v52 }
  0xc3   :  { %v1036_v0 = vadd.f32 %v1025_v54, %v1006_v1  ;;  %v568_v42 = vsel %vm375_vm5, %v565_v4, %v567_v27  ;;  %v2091_v48 = vrot.slane %v1572_v44, 1  ;;  %v281_v49 = vsel %vm271_vm1, %v1442_v20, %v1526_v37 }
  0xc4   :  { %v1579_v58 = vadd.f32 %v568_v42, %v549_v26  ;;  %v278_v53 = vsel %vm271_vm1, %v1518_v21, %v1487_v51  ;;  %v297_v1 = vmul.f32 -0.24999997, %v1500_v63  ;;  %v1603_v2 = vmul.f32 0.24999997, %v1500_v63 }
  0xc5   :  { %v1054_v13 = vadd.f32 %v1043_v8, %v1036_v0  ;;  %v1606_v20 = vmul.f32 -0.19999996, %v1490_v52  ;;  %v316_v3 = vsel %vm313_vm3, %v314_v32, %v315_v35  ;;  %v1623_v0 = vsel %vm344_vm4, %v345_v46, %v346_v36 }
  0xc6   :  { %v488_v26 = vmul.f32 -0.49999988, %v1500_v63  ;;  %v805_v6 = vrot.slane %v1635_v29, 2 }
  0xc7   :  { %1107 = vrot.lane.b32.xlu0 %v1079_v11, %s1347_s2  ;;  %v1080_v24 = vadd.f32 %v1069_v16, %v1054_v13  ;;  %v1631_v11 = vadd.f32 %v316_v3, %v297_v1  ;;  %v492_v3 = vmul.f32 -0.99999905, %v1500_v63 }
  0xc9   :  { %1109 = vrot.lane.b32.xlu1 %v1080_v24, %s1347_s2  ;;  %v250_v19 = vpop.permute.xlu1 %249  ;;  %v1637_v36 = vpop.permute.xlu2 %251  ;;  %v282_v24 = vsel %vm271_vm1, %v1541_v61, %v256_v23 }
  0xca   :  { %v279_v59 = vsel %vm271_vm1, %v1435_v12, %v250_v19  ;;  %v225_v39 = vpop.permute.xlu0 %224 }
  0xcb   :  { %v1582_v12 = vsel %vm284_vm2, %v279_v59, %v217_v7  ;;  %v1617_v54 = vsel %vm284_vm2, %v281_v49, %v225_v39  ;;  %v775_v7 = vrot.slane %v1585_v47, 1 }
  0xcc   :  { %v1595_v57 = vmul.f32 -0.49999976, %v1582_v12  ;;  %v1611_v37 = vmul.f32 0.49999976, %v1582_v12  ;;  %v1628_v28 = vmul.f32 0.39999992, %v1582_v12 }
  0xcd   :  { %v982_v22 = vmul.f32 0.39999992, %v1617_v54  ;;  %v1649_v19 = vsel %vm313_vm3, %v775_v7, %v2091_v48  ;;  %v977_v42 = vmul.f32 0.24999997, %v1617_v54  ;;  %v1012_v43 = vmul.f32 0.49999988, %v1617_v54 }
  0xce   :  { %v416_v8 = vrot.slane %v1595_v57, 1  ;;  %v2094_v16 = vrot.slane %v1611_v37, 3  ;;  %v2093_v38 = vrot.slane %v1628_v28, 4  ;;  %v1662_v32 = vmul.f32 -0.19999996, %v1617_v54 }
  0xcf   :  { %v1665_v46 = vmul.f32 -0.49999976, %v1617_v54  ;;  %v996_v39 = vrot.slane %v982_v22, 1 }
  0xd1   :  { %v213_v56 = vpop.permute.xlu1 %212  ;;  %v233_v60 = vpop.permute.xlu2 %232 }
  0xd2   :  { %v1599_v62 = vsel %vm284_vm2, %v278_v53, %v213_v56 }
  0xd3   :  { %v401_v51 = vmul.f32 -0.49999976, %v1599_v62  ;;  %v431_v21 = vmul.f32 0.49999976, %v1599_v62  ;;  %v461_v5 = vmul.f32 0.39999992, %v1599_v62 }
  0xd4   :  { %v396_v35 = vmul.f32 -0.39999992, %v1599_v62 }
  0xd5   :  { %v415_v9 = vrot.slane %v401_v51, 1  ;;  %v445_v10 = vrot.slane %v431_v21, 3  ;;  %v475_v17 = vrot.slane %v461_v5, 4  ;;  %v796_v21 = vmul.f32 -0.99999905, %v1617_v54 }
  0xd7   :  { %v417_v15 = vsel %vm313_vm3, %v415_v9, %v416_v8  ;;  %v447_v59 = vsel %vm344_vm4, %v445_v10, %v2094_v16  ;;  %v477_v49 = vsel %vm375_vm5, %v475_v17, %v2093_v38 }
  0xd8   :  { %v426_v25 = vadd.f32 %v417_v15, %v396_v35  ;;  %v1026_v35 = vrot.slane %v1012_v43, 2  ;;  %v780_v15 = vrot.slane %v1665_v46, 1  ;;  %v552_v43 = vmul.f32 0.49999988, %v1500_v63 }
  0xd9   :  { %v229_v27 = vpop.permute.xlu1 %228 }
  0xda   :  { %v1659_v61 = vsel %vm284_vm2, %v282_v24, %v229_v27  ;;  %v456_v23 = vadd.f32 %v447_v59, %v426_v25  ;;  %v522_v24 = vmul.f32 0.99999905, %v1500_v63  ;;  %v1044_v27 = vrot.slane %v982_v22, 3 }
  0xdb   :  { %v1671_v53 = vmul.f32 0.39999992, %v1659_v61  ;;  %v1674_v56 = vmul.f32 0.49999988, %v1659_v61  ;;  %v1677_v51 = vmul.f32 -0.49999976, %v1659_v61 }
  0xdc   :  { %v486_v1 = vadd.f32 %v477_v49, %v456_v23  ;;  %v1682_v5 = vmul.f32 0.24999997, %v1659_v61  ;;  %v1687_v10 = vmul.f32 -0.99999905, %v1659_v61  ;;  %v1070_v23 = vrot.slane %v977_v42, 4  ;;  %v258_v49 = vpop.permute.xlu0 %257 }
  0xdd   :  { %v997_v7 = vrot.slane %v1671_v53, 1  ;;  %v1027_v9 = vrot.slane %v1674_v56, 2  ;;  %v781_v17 = vrot.slane %v1677_v51, 1  ;;  %v1045_v59 = vrot.slane %v1671_v53, 3 }
  0xde   :  { %590 = vrot.lane.b32.xlu2 %v486_v1, %s1347_s2  ;;  %v810_v1 = vrot.slane %v796_v21, 2  ;;  %v1071_v40 = vrot.slane %v1682_v5, 4  ;;  %v504_v22 = vrot.slane %v492_v3, 1  ;;  %v1703_v16 = vmul.f32 -0.19999996, %v1659_v61 }
  0xdf   :  { %v998_v25 = vsel %vm313_vm3, %v996_v39, %v997_v7  ;;  %v782_v48 = vsel %vm313_vm3, %v780_v15, %v781_v17  ;;  %v1028_v13 = vsel %vm696_vm6, %v1026_v35, %v1027_v9  ;;  %v811_v39 = vrot.slane %v1687_v10, 2 }
  0xe0   :  { %v1007_v56 = vadd.f32 %v998_v25, %v977_v42  ;;  %v791_v42 = vadd.f32 %v782_v48, %v1662_v32  ;;  %v534_v25 = vrot.slane %v522_v24, 3  ;;  %v1046_v63 = vsel %vm344_vm4, %v1044_v27, %v1045_v59 }
  0xe1   :  { %v829_v15 = vrot.slane %v1677_v51, 3  ;;  %v506_v35 = vsel %vm313_vm3, %v504_v22, %v505_v50  ;;  %v1072_v24 = vsel %vm375_vm5, %v1070_v23, %v1071_v40  ;;  %v1893_v51 = vmul.f32 0.19999996, %v1659_v61 }
  0xe2   :  { %v185_v38 = vpop.permute.xlu1 %184  ;;  %v1037_v53 = vadd.f32 %v1028_v13, %v1007_v56  ;;  %v518_v56 = vadd.f32 %v506_v35, %v488_v26  ;;  %v536_v48 = vsel %vm344_vm4, %v534_v25, %v535_v18  ;;  %v828_v18 = vrot.slane %v1665_v46, 3 }
  0xe3   :  { %v283_v21 = vsel %vm271_vm1, %v185_v38, %v258_v49  ;;  %v812_v38 = vsel %vm696_vm6, %v810_v1, %v811_v39  ;;  %v855_v1 = vrot.slane %v1703_v16, 4  ;;  %v854_v35 = vrot.slane %v1662_v32, 4 }
  0xe4   :  { %v1713_v3 = vsel %vm284_vm2, %v283_v21, %v233_v60  ;;  %v1055_v13 = vadd.f32 %v1046_v63, %v1037_v53  ;;  %v821_v49 = vadd.f32 %v812_v38, %v791_v42  ;;  %v1726_v60 = vadd.f32 %v1623_v0, %v1631_v11 }
  0xe5   :  { %v984_v27 = vmul.f32 0.39999992, %v1713_v3  ;;  %v1014_v41 = vmul.f32 0.49999988, %v1713_v3  ;;  %v1058_v22 = vmul.f32 0.24999997, %v1713_v3  ;;  %v1735_v53 = vadd.f32 %v1649_v19, %v1606_v20 }
  0xe6   :  { %v1081_v50 = vadd.f32 %v1072_v24, %v1055_v13  ;;  %v1738_v42 = vmul.f32 -0.49999976, %v1529_v31  ;;  %v564_v0 = vrot.slane %v552_v43, 4  ;;  %v280_v11 = vsel %vm271_vm1, %v1574_v45, %v1637_v36 }
  0xe7   :  { %v999_v26 = vrot.slane %v984_v27, 1  ;;  %v1029_v23 = vrot.slane %v1014_v41, 2  ;;  %v830_v46 = vsel %vm344_vm4, %v828_v18, %v829_v15  ;;  %v1047_v21 = vrot.slane %v984_v27, 3 }
  0xe8   :  { %1111 = vrot.lane.b32.xlu0 %v1081_v50, %s1347_s2  ;;  %v839_v63 = vadd.f32 %v830_v46, %v821_v49  ;;  %v397_v13 = vmul.f32 -0.39999992, %v1582_v12  ;;  %v1073_v38 = vrot.slane %v1058_v22, 4  ;;  %v548_v41 = vadd.f32 %v536_v48, %v518_v56 }
  0xe9   :  { %v1000_v25 = vsel %vm313_vm3, %v997_v7, %v999_v26  ;;  %v1030_v43 = vsel %vm696_vm6, %v1027_v9, %v1029_v23  ;;  %v1752_v45 = vmul.f32 -0.99999905, %v1582_v12  ;;  %v856_v7 = vsel %vm375_vm5, %v854_v35, %v855_v1 }
  0xea   :  { %v1008_v19 = vadd.f32 %v1000_v25, %v1682_v5  ;;  %v566_v5 = vsel %vm375_vm5, %v564_v0, %v565_v4  ;;  %v1048_v27 = vsel %vm344_vm4, %v1045_v59, %v1047_v21  ;;  %v865_v50 = vadd.f32 %v856_v7, %v839_v63 }
  0xeb   :  { %v221_v24 = vpop.permute.xlu1 %220  ;;  %v1767_v18 = vadd.f32 %v566_v5, %v548_v41  ;;  %v495_v26 = vmul.f32 -0.99999905, %v1599_v62  ;;  %v1074_v23 = vsel %vm375_vm5, %v1071_v40, %v1073_v38  ;;  %v510_v4 = vrot.slane %v1752_v45, 1 }
  0xec   :  { %v1755_v36 = vsel %vm284_vm2, %v280_v11, %v221_v24  ;;  %v1038_v32 = vadd.f32 %v1030_v43, %v1008_v19  ;;  %v525_v11 = vmul.f32 0.99999905, %v1599_v62  ;;  %v1775_v46 = vmul.f32 0.99999905, %v1582_v12 }
  0xed   :  { %v403_v9 = vmul.f32 -0.49999976, %v1755_v36  ;;  %v433_v56 = vmul.f32 0.49999976, %v1755_v36  ;;  %v463_v48 = vmul.f32 0.39999992, %v1755_v36 }
  0xee   :  { %v1056_v49 = vadd.f32 %v1048_v27, %v1038_v32  ;;  %v509_v0 = vrot.slane %v495_v26, 1  ;;  %v778_v40 = vrot.slane %v1738_v42, 1  ;;  %v490_v63 = vmul.f32 -0.49999988, %v1599_v62 }
  0xef   :  { %v418_v22 = vrot.slane %v403_v9, 1  ;;  %v448_v14 = vrot.slane %v433_v56, 3  ;;  %v478_v21 = vrot.slane %v463_v48, 4  ;;  %v539_v24 = vrot.slane %v525_v11, 3 }
  0xf0   :  { %1091 = vrot.lane.b32.xlu0 %v865_v50, %s1347_s2  ;;  %v1082_v59 = vadd.f32 %v1074_v23, %v1056_v49  ;;  %v511_v19 = vsel %vm313_vm3, %v509_v0, %v510_v4  ;;  %v540_v43 = vrot.slane %v1775_v46, 3  ;;  %v2095_v38 = vrot.slane %v1611_v37, 3 }
  0xf1   :  { %v419_v25 = vsel %vm313_vm3, %v416_v8, %v418_v22  ;;  %v520_v8 = vadd.f32 %v511_v19, %v490_v63  ;;  %v555_v41 = vmul.f32 0.49999988, %v1599_v62  ;;  %v1792_v7 = vmul.f32 0.49999988, %v1582_v12 }
  0xf2   :  { %1113 = vrot.lane.b32.xlu1 %v1082_v59, %s1347_s2  ;;  %v427_v35 = vadd.f32 %v419_v25, %v397_v13  ;;  %v449_v57 = vsel %vm344_vm4, %v2095_v38, %v448_v14  ;;  %v795_v13 = vmul.f32 -0.99999905, %v1529_v31  ;;  %v304_v5 = vmul.f32 -0.19999996, %v1599_v62 }
  0xf3   :  { %v541_v27 = vsel %vm344_vm4, %v539_v24, %v540_v43  ;;  %v2096_v9 = vrot.slane %v1628_v28, 4  ;;  %v569_v48 = vrot.slane %v555_v41, 4  ;;  %v570_v50 = vrot.slane %v1792_v7, 4 }
  0xf4   :  { %v457_v32 = vadd.f32 %v449_v57, %v427_v35  ;;  %v550_v56 = vadd.f32 %v541_v27, %v520_v8  ;;  %v2097_v26 = vrot.slane %v1463_v33, 4  ;;  %v2098_v23 = vrot.slane %v1603_v2, 4 }
  0xf5   :  { %v479_v37 = vsel %vm375_vm5, %v2096_v9, %v478_v21  ;;  %v2099_v14 = vrot.slane %v1577_v55, 2  ;;  %v823_v28 = vrot.slane %v1585_v47, 3  ;;  %v2100_v0 = vrot.slane %v1572_v44, 1 }
  0xf6   :  { %v487_v49 = vadd.f32 %v479_v37, %v457_v32  ;;  %v378_v22 = vsel %vm375_vm5, %v2098_v23, %v2097_v26  ;;  %v1818_v25 = vmul.f32 -0.19999996, %v1582_v12  ;;  %v768_v33 = vmul.f32 -0.49999976, %v1713_v3 }
  0xf7   :  { %v807_v59 = vsel %vm696_vm6, %v805_v6, %v2099_v14  ;;  %v779_v11 = vsel %vm313_vm3, %v2100_v0, %v778_v40  ;;  %v571_v2 = vsel %vm375_vm5, %v569_v48, %v570_v50  ;;  %v1826_v29 = vadd.f32 %v378_v22, %v1726_v60 }
  0xf8   :  { %592 = vrot.lane.b32.xlu2 %v487_v49, %s1347_s2  ;;  %v760_v47 = vmul.f32 -0.19999996, %v1459_v30  ;;  %v819_v6 = vadd.f32 %v807_v59, %v1735_v53  ;;  %v1830_v21 = vadd.f32 %v571_v2, %v550_v56  ;;  %v824_v40 = vrot.slane %v1572_v44, 3 }
  0xf9   :  { %v808_v63 = vrot.slane %v795_v13, 2  ;;  %v319_v35 = vrot.slane %v304_v5, 1  ;;  %v849_v19 = vrot.slane %v1606_v20, 4  ;;  %v320_v38 = vrot.slane %v1818_v25, 1 }
  0xfa   :  { %630 = vrot.lane.b32.xlu1 %v1826_v29, %s1348_s28  ;;  %v790_v24 = vadd.f32 %v779_v11, %v760_v47  ;;  %v825_v60 = vsel %vm344_vm4, %v823_v28, %v824_v40  ;;  %v335_v57 = vmul.f32 0.19999996, %v1599_v62  ;;  %v783_v53 = vrot.slane %v768_v33, 1 }
  0xfb   :  { %v837_v8 = vadd.f32 %v825_v60, %v819_v6  ;;  %v850_v41 = vrot.slane %v760_v47, 4  ;;  %v826_v44 = vrot.slane %v1738_v42, 3  ;;  %v841_v32 = vmul.f32 -0.19999996, %v1529_v31 }
  0xfc   :  { %v2101_v13 = vmov %v2099_v14  ;;  %v321_v20 = vsel %vm313_vm3, %v319_v35, %v320_v38  ;;  %v1848_v27 = vmul.f32 0.19999996, %v1582_v12  ;;  %v798_v9 = vmul.f32 -0.99999905, %v1713_v3 }
  0xfd   :  { %v809_v5 = vsel %vm696_vm6, %v2101_v13, %v808_v63  ;;  %v299_v56 = vmul.f32 -0.24999997, %v1599_v62  ;;  %v851_v42 = vsel %vm375_vm5, %v849_v19, %v850_v41  ;;  %v350_v48 = vrot.slane %v335_v57, 3 }
  0xfe   :  { %v820_v37 = vadd.f32 %v809_v5, %v790_v24  ;;  %v366_v49 = vmul.f32 0.24999997, %v1599_v62  ;;  %v784_v55 = vsel %vm313_vm3, %v781_v17, %v783_v53  ;;  %v863_v26 = vadd.f32 %v851_v42, %v837_v8 }
  0xff   :  { %v852_v23 = vrot.slane %v841_v32, 4  ;;  %v330_v22 = vadd.f32 %v321_v20, %v299_v56  ;;  %v827_v14 = vsel %vm344_vm4, %v824_v40, %v826_v44  ;;  %v351_v59 = vrot.slane %v1848_v27, 3 }
 0x100   :  { %632 = vrot.lane.b32.xlu2 %v1524_v34, %s1348_s28  ;;  %v1862_v28 = vmul.f32 0.24999997, %v1582_v12  ;;  %v813_v0 = vrot.slane %v798_v9, 2  ;;  %v838_v62 = vadd.f32 %v827_v14, %v820_v37  ;;  %v792_v11 = vadd.f32 %v784_v55, %v1703_v16 }
 0x101   :  { %v352_v17 = vsel %vm344_vm4, %v350_v48, %v351_v59  ;;  %v381_v2 = vrot.slane %v366_v49, 4  ;;  %v853_v47 = vsel %vm375_vm5, %v850_v41, %v852_v23  ;;  %v831_v35 = vrot.slane %v768_v33, 3 }
 0x102   :  { %1087 = vrot.lane.b32.xlu1 %v863_v26, %s1347_s2  ;;  %v361_v6 = vadd.f32 %v352_v17, %v330_v22  ;;  %v382_v40 = vrot.slane %v1862_v28, 4  ;;  %v814_v63 = vsel %vm696_vm6, %v811_v39, %v813_v0  ;;  %v842_v19 = vmul.f32 -0.19999996, %v1713_v3 }
 0x103   :  { %v864_v24 = vadd.f32 %v853_v47, %v838_v62  ;;  %v822_v60 = vadd.f32 %v814_v63, %v792_v11  ;;  %v832_v8 = vsel %vm344_vm4, %v829_v15, %v831_v35  ;;  %v869_v33 = vmul.f32 0.19999996, %v1617_v54 }
 0x104   :  { %v383_v57 = vsel %vm375_vm5, %v381_v2, %v382_v40  ;;  %v857_v10 = vrot.slane %v842_v19, 4  ;;  %v874_v41 = vmul.f32 0.49999976, %v1617_v54  ;;  %v904_v44 = vmul.f32 0.99999905, %v1617_v54 }
 0x105   :  { %v1879_v53 = vadd.f32 %v383_v57, %v361_v6  ;;  %v840_v39 = vadd.f32 %v832_v8, %v822_v60  ;;  %v1896_v15 = vmul.f32 0.49999976, %v1659_v61  ;;  %v1899_v5 = vmul.f32 0.99999905, %v1659_v61 }
 0x106   :  { %v858_v32 = vsel %vm375_vm5, %v855_v1, %v857_v10  ;;  %v888_v20 = vrot.slane %v874_v41, 1  ;;  %v918_v9 = vrot.slane %v904_v44, 2  ;;  %v936_v37 = vrot.slane %v874_v41, 3 }
 0x107   :  { %v866_v13 = vadd.f32 %v858_v32, %v840_v39  ;;  %v962_v56 = vrot.slane %v869_v33, 4  ;;  %v889_v16 = vrot.slane %v1896_v15, 1  ;;  %v919_v1 = vrot.slane %v1899_v5, 2 }
 0x108   :  { %1089 = vrot.lane.b32.xlu2 %v864_v24, %s1347_s2  ;;  %v937_v42 = vrot.slane %v1896_v15, 3  ;;  %v963_v48 = vrot.slane %v1893_v51, 4  ;;  %v657_v14 = vmul.f32 -0.39999992, %v1617_v54  ;;  %v687_v0 = vmul.f32 -0.49999988, %v1617_v54 }
 0x109   :  { %v890_v49 = vsel %vm313_vm3, %v888_v20, %v889_v16  ;;  %v920_v55 = vsel %vm696_vm6, %v918_v9, %v919_v1  ;;  %v652_v11 = vmul.f32 -0.24999997, %v1617_v54  ;;  %v1922_v2 = vmul.f32 -0.24999997, %v1659_v61 }
 0x10a   :  { %634 = vrot.lane.b32.xlu1 %v1879_v53, %s1348_s28  ;;  %v938_v26 = vsel %vm344_vm4, %v936_v37, %v937_v42  ;;  %v964_v23 = vsel %vm375_vm5, %v962_v56, %v963_v48  ;;  %v899_v22 = vadd.f32 %v890_v49, %v869_v33  ;;  %v1925_v47 = vmul.f32 -0.39999992, %v1659_v61 }
 0x10b   :  { %v1928_v6 = vmul.f32 -0.49999988, %v1659_v61  ;;  %v671_v63 = vrot.slane %v657_v14, 1  ;;  %v702_v35 = vrot.slane %v687_v0, 2  ;;  %v720_v19 = vrot.slane %v657_v14, 3 }
 0x10c   :  { %v929_v62 = vadd.f32 %v920_v55, %v899_v22  ;;  %v672_v60 = vrot.slane %v1925_v47, 1  ;;  %v721_v54 = vrot.slane %v1925_v47, 3  ;;  %v746_v8 = vrot.slane %v652_v11, 4 }
 0x10d   :  { %v703_v57 = vrot.slane %v1928_v6, 2  ;;  %v747_v10 = vrot.slane %v1922_v2, 4  ;;  %v306_v32 = vmul.f32 -0.19999996, %v1755_v36  ;;  %v368_v20 = vmul.f32 0.24999997, %v1755_v36 }
 0x10e   :  { %v947_v17 = vadd.f32 %v938_v26, %v929_v62  ;;  %v673_v39 = vsel %vm313_vm3, %v671_v63, %v672_v60  ;;  %v722_v33 = vsel %vm344_vm4, %v720_v19, %v721_v54  ;;  %v871_v37 = vmul.f32 0.49999976, %v1490_v52 }
 0x10f   :  { %v704_v61 = vsel %vm696_vm6, %v702_v35, %v703_v57  ;;  %v682_v41 = vadd.f32 %v673_v39, %v652_v11  ;;  %v748_v44 = vsel %vm375_vm5, %v746_v8, %v747_v10  ;;  %v300_v56 = vmul.f32 -0.24999997, %v1582_v12 }
 0x110   :  { %1093 = vrot.lane.b32.xlu2 %v866_v13, %s1347_s2  ;;  %v1930_v24 = vadd.f32 %v964_v23, %v947_v17  ;;  %v337_v13 = vmul.f32 0.19999996, %v1755_v36  ;;  %v322_v49 = vrot.slane %v306_v32, 1  ;;  %v497_v26 = vmul.f32 -0.99999905, %v1755_v36 }
 0x111   :  { %v713_v9 = vadd.f32 %v704_v61, %v682_v41  ;;  %v527_v23 = vmul.f32 0.99999905, %v1755_v36  ;;  %v557_v22 = vmul.f32 0.49999988, %v1755_v36  ;;  %v872_v0 = vmul.f32 0.49999976, %v1459_v30 }
 0x112   :  { %v353_v55 = vrot.slane %v337_v13, 3  ;;  %v873_v62 = vmul.f32 0.49999976, %v1529_v31  ;;  %v323_v11 = vsel %vm313_vm3, %v320_v38, %v322_v49  ;;  %v384_v17 = vrot.slane %v368_v20, 4 }
 0x113   :  { %v731_v14 = vadd.f32 %v722_v33, %v713_v9  ;;  %v331_v63 = vadd.f32 %v323_v11, %v300_v56  ;;  %v512_v35 = vrot.slane %v497_v26, 1  ;;  %v542_v19 = vrot.slane %v527_v23, 3 }
 0x114   :  { %v572_v8 = vrot.slane %v557_v22, 4  ;;  %v883_v39 = vrot.slane %v871_v37, 1  ;;  %v354_v61 = vsel %vm344_vm4, %v351_v59, %v353_v55  ;;  %v491_v36 = vmul.f32 -0.49999988, %v1582_v12 }
 0x115   :  { %v1965_v33 = vadd.f32 %v748_v44, %v731_v14  ;;  %v362_v41 = vadd.f32 %v354_v61, %v331_v63  ;;  %v513_v25 = vsel %vm313_vm3, %v510_v4, %v512_v35  ;;  %v543_v38 = vsel %vm344_vm4, %v540_v43, %v542_v19 }
 0x116   :  { %v573_v32 = vsel %vm375_vm5, %v570_v50, %v572_v8  ;;  %v385_v27 = vsel %vm375_vm5, %v382_v40, %v384_v17  ;;  %v521_v12 = vadd.f32 %v513_v25, %v491_v36  ;;  %v884_v44 = vrot.slane %v872_v0, 1 }
 0x117   :  { %v901_v13 = vmul.f32 0.99999905, %v1490_v52  ;;  %v886_v45 = vrot.slane %v873_v62, 1  ;;  %v393_v20 = vadd.f32 %v385_v27, %v362_v41  ;;  %v902_v50 = vmul.f32 0.99999905, %v1459_v30 }
 0x118   :  { %v551_v43 = vadd.f32 %v543_v38, %v521_v12  ;;  %v885_v7 = vsel %vm313_vm3, %v883_v39, %v884_v44  ;;  %v903_v28 = vmul.f32 0.99999905, %v1529_v31  ;;  %v867_v40 = vmul.f32 0.19999996, %v1490_v52 }
 0x119   :  { %v913_v56 = vrot.slane %v901_v13, 2  ;;  %v887_v49 = vsel %vm313_vm3, %v884_v44, %v886_v45  ;;  %v931_v14 = vrot.slane %v871_v37, 3  ;;  %v932_v63 = vrot.slane %v872_v0, 3 }
 0x11a   :  { %v581_v9 = vadd.f32 %v573_v32, %v551_v43  ;;  %v897_v55 = vadd.f32 %v885_v7, %v867_v40  ;;  %v916_v26 = vrot.slane %v903_v28, 2  ;;  %v934_v19 = vrot.slane %v873_v62, 3 }
 0x11b   :  { %v949_v8 = vmul.f32 0.19999996, %v1529_v31  ;;  %v933_v41 = vsel %vm344_vm4, %v931_v14, %v932_v63  ;;  %v957_v25 = vrot.slane %v867_v40, 4 }
 0x11c   :  { %v935_v0 = vsel %vm344_vm4, %v932_v63, %v934_v19 }
 0x11d   :  { %v960_v32 = vrot.slane %v949_v8, 4  ;;  %v655_v8 = vmul.f32 -0.39999992, %v1459_v30 }
 0x127   :  { %v589_v59 = vpop.permute.xlu1 %588 }
 0x128   :  { %v1981_v4 = vadd.f32 %v589_v59, %v1524_v34  ;;  %v603_v46 = vadd.f32 %v589_v59, %v1579_v58  ;;  %v868_v34 = vmul.f32 0.19999996, %v1459_v30  ;;  %v914_v58 = vrot.slane %v902_v50, 2 }
 0x129   :  { %v876_v50 = vmul.f32 0.49999976, %v1713_v3 }
 0x12a   :  { %612 = vrot.lane.b32.xlu0 %v603_v46, %s1349_s29  ;;  %v898_v23 = vadd.f32 %v887_v49, %v868_v34  ;;  %v915_v22 = vsel %vm696_vm6, %v913_v56, %v914_v58  ;;  %v917_v35 = vsel %vm696_vm6, %v914_v58, %v916_v26  ;;  %v958_v38 = vrot.slane %v868_v34, 4 }
 0x12b   :  { %v927_v11 = vadd.f32 %v915_v22, %v897_v55  ;;  %v950_v22 = vmul.f32 0.19999996, %v1713_v3 }
 0x12c   :  { %v928_v36 = vadd.f32 %v917_v35, %v898_v23  ;;  %v959_v62 = vsel %vm375_vm5, %v957_v25, %v958_v38  ;;  %v961_v13 = vsel %vm375_vm5, %v958_v38, %v960_v32  ;;  %v939_v23 = vrot.slane %v876_v50, 3 }
 0x12d   :  { %v945_v37 = vadd.f32 %v933_v41, %v927_v11  ;;  %v965_v14 = vrot.slane %v950_v22, 4  ;;  %v654_v41 = vmul.f32 -0.39999992, %v1490_v52 }
 0x12e   :  { %v946_v27 = vadd.f32 %v935_v0, %v928_v36  ;;  %v667_v36 = vrot.slane %v655_v8, 1 }
 0x12f   :  { %v971_v59 = vadd.f32 %v959_v62, %v945_v37  ;;  %v651_v37 = vmul.f32 -0.24999997, %v1459_v30  ;;  %v666_v32 = vrot.slane %v654_v41, 1 }
 0x130   :  { %v972_v46 = vadd.f32 %v961_v13, %v946_v27 }
 0x131   :  { %v587_v17 = vpop.permute.xlu0 %586  ;;  %v668_v13 = vsel %vm313_vm3, %v666_v32, %v667_v36 }
 0x132   :  { %v1995_v39 = vadd.f32 %v587_v17, %v1826_v29  ;;  %v602_v61 = vadd.f32 %v587_v17, %v1767_v18  ;;  %v966_v17 = vsel %vm375_vm5, %v963_v48, %v965_v14 }
 0x134   :  { %610 = vrot.lane.b32.xlu2 %v602_v61, %s1349_s29 }
 0x138   :  { %v591_v12 = vpop.permute.xlu2 %590 }
 0x139   :  { %v2003_v29 = vadd.f32 %v591_v12, %v1879_v53  ;;  %v604_v18 = vadd.f32 %v591_v12, %v1830_v21  ;;  %v1108_v44 = vpop.permute.xlu0 %1107  ;;  %v891_v53 = vrot.slane %v876_v50, 1  ;;  %v906_v21 = vmul.f32 0.99999905, %v1713_v3 }
 0x13a   :  { %v1119_v45 = vadd.f32 %v1108_v44, %v971_v59  ;;  %v684_v12 = vmul.f32 -0.49999988, %v1490_v52  ;;  %v733_v44 = vmul.f32 -0.24999997, %v1529_v31 }
 0x13b   :  { %v1110_v43 = vpop.permute.xlu1 %1109  ;;  %614 = vrot.lane.b32.xlu0 %v604_v18, %s1349_s29  ;;  %v892_v49 = vsel %vm313_vm3, %v889_v16, %v891_v53  ;;  %v921_v34 = vrot.slane %v906_v21, 2  ;;  %v940_v16 = vsel %vm344_vm4, %v937_v42, %v939_v23  ;;  %v686_v42 = vmul.f32 -0.49999988, %v1529_v31 }
 0x13c   :  { %v1120_v7 = vadd.f32 %v1110_v43, %v972_v46  ;;  %1127 = vrot.lane.b32.xlu1 %v1119_v45, %s1350_s30  ;;  %v900_v55 = vadd.f32 %v892_v49, %v1893_v51  ;;  %v685_v51 = vmul.f32 -0.49999988, %v1459_v30  ;;  %v650_v43 = vmul.f32 -0.24999997, %v1490_v52 }
 0x13d   :  { %v922_v26 = vsel %vm696_vm6, %v919_v1, %v921_v34  ;;  %v700_v38 = vrot.slane %v686_v42, 2  ;;  %v716_v30 = vrot.slane %v655_v8, 3  ;;  %v744_v21 = vrot.slane %v733_v44, 4 }
 0x13e   :  { %1129 = vrot.lane.b32.xlu2 %v1120_v7, %s1350_s30  ;;  %v698_v62 = vrot.slane %v685_v51, 2  ;;  %v697_v7 = vrot.slane %v684_v12, 2  ;;  %v680_v53 = vadd.f32 %v668_v13, %v650_v43  ;;  %v742_v34 = vrot.slane %v651_v37, 4  ;;  %v1154_v13 = vld [vmem:[#allocation7 + $0x18] sm:$0xff] }
 0x140   :  { %v701_v59 = vsel %vm696_vm6, %v698_v62, %v700_v38  ;;  %v745_v23 = vsel %vm375_vm5, %v742_v34, %v744_v21 }
 0x144   :  { %636 = vrot.lane.b32.xlu1 %v393_v20, %s1348_s28 }
 0x152   :  { %v593_v28 = vpop.permute.xlu2 %592 }
 0x153   :  { %v2011_v40 = vadd.f32 %v593_v28, %v393_v20  ;;  %v605_v56 = vadd.f32 %v593_v28, %v581_v9  ;;  %v930_v9 = vadd.f32 %v922_v26, %v900_v55  ;;  %v699_v55 = vsel %vm696_vm6, %v697_v7, %v698_v62 }
 0x155   :  { %616 = vrot.lane.b32.xlu0 %v605_v56, %s1349_s29  ;;  %v948_v11 = vadd.f32 %v940_v16, %v930_v9 }
 0x157   :  { %v974_v5 = vadd.f32 %v966_v17, %v948_v11 }
 0x15a   :  { %v1112_v58 = vpop.permute.xlu0 %1111  ;;  %v633_v35 = vpop.permute.xlu2 %632 }
 0x15b   :  { %v1121_v20 = vadd.f32 %v1112_v58, %v1930_v24  ;;  %v656_v24 = vmul.f32 -0.39999992, %v1529_v31  ;;  %v715_v58 = vrot.slane %v654_v41, 3  ;;  %v711_v31 = vadd.f32 %v699_v55, %v680_v53 }
 0x15d   :  { %1131 = vrot.lane.b32.xlu0 %v1121_v20, %s1350_s30  ;;  %v669_v61 = vrot.slane %v656_v24, 1  ;;  %v718_v18 = vrot.slane %v656_v24, 3  ;;  %v717_v52 = vsel %vm344_vm4, %v715_v58, %v716_v30  ;;  %v741_v20 = vrot.slane %v650_v43, 4 }
 0x15e   :  { %v729_v11 = vadd.f32 %v717_v52, %v711_v31  ;;  %v1179_v43 = vmax.f32 %v1154_v13, 1e-06  ;;  %v734_v58 = vmul.f32 -0.24999997, %v1713_v3 }
 0x15f   :  { %v670_v48 = vsel %vm313_vm3, %v667_v36, %v669_v61  ;;  %v719_v28 = vsel %vm344_vm4, %v716_v30, %v718_v18 }
 0x160   :  { %v681_v27 = vadd.f32 %v670_v48, %v651_v37  ;;  %v1152_v37 = vld [vmem:[#allocation7 + $0x8] sm:$0xff]  ;;  %v749_v52 = vrot.slane %v734_v58, 4 }
 0x162   :  { %v1090_v19 = vpop.permute.xlu2 %1089  ;;  %v2038_v0 = vpop.permute.xlu0 %1091  ;;  %v712_v46 = vadd.f32 %v701_v59, %v681_v27  ;;  %v1153_v59 = vld [vmem:[#allocation7 + $0x10] sm:$0xff]  ;;  %v750_v6 = vsel %vm375_vm5, %v747_v10, %v749_v52 }
 0x164   :  { %v1114_v63 = vpop.permute.xlu1 %1113  ;;  %v730_v49 = vadd.f32 %v719_v28, %v712_v46  ;;  %v1178_v46 = vmax.f32 %v1153_v59, 1e-06 }
 0x165   :  { %v1122_v1 = vadd.f32 %v1114_v63, %v974_v5 }
 0x166   :  { %v756_v22 = vadd.f32 %v745_v23, %v730_v49  ;;  %v1183_v21 = vsel %vm1159_vm7, %v1178_v46, 0.0  ;;  %v1185_v49 = vsel %vm1159_vm7, %v1179_v43, 0.0 }
 0x167   :  { %1133 = vrot.lane.b32.xlu2 %v1122_v1, %s1350_s30  ;;  %v743_v1 = vsel %vm375_vm5, %v741_v20, %v742_v34 }
 0x168   :  { %v1100_v14 = vadd.f32 %v1090_v19, %v756_v22  ;;  %v755_v24 = vadd.f32 %v743_v1, %v729_v11  ;;  %v689_v19 = vmul.f32 -0.49999988, %v1713_v3 }
 0x16a   :  { %v2035_v25 = vpop.permute.xlu2 %1093 }
 0x16c   :  { %v631_v15 = vpop.permute.xlu1 %630 }
 0x174   :  { %v1088_v45 = vpop.permute.xlu1 %1087 }
 0x175   :  { %v1099_v61 = vadd.f32 %v1088_v45, %v755_v24  ;;  %v1177_v45 = vmax.f32 %v1152_v37, 1e-06 }
 0x177   :  { %v1181_v28 = vsel %vm1159_vm7, %v1177_v45, 0.0 }
 0x17c   :  { %v2050_v9 = vpop.permute.xlu1 %634 }
 0x18e   :  { %v611_v50 = vpop.permute.xlu2 %610 }
 0x18f   :  { %v622_v5 = vadd.f32 %v611_v50, %v1995_v39  ;;  %v1151_v39 = vld [vmem:[#allocation7] sm:$0xff] }
 0x190   :  { %v1176_v62 = vmax.f32 %v1151_v39, 1e-06 }
 0x191   :  { %v642_v36 = vadd.f32 %v631_v15, %v622_v5  ;;  %v705_v15 = vrot.slane %v689_v19, 2 }
 0x192   :  { %v1180_v30 = vsel %vm1159_vm7, %v1176_v62, 0.0 }
 0x193   :  { %v706_v34 = vsel %vm696_vm6, %v703_v57, %v705_v15 }
 0x198   :  { %v1130_v16 = vpop.permute.xlu2 %1129 }
 0x199   :  { %v1140_v63 = vadd.f32 %v1130_v16, %v1100_v14 }
 0x19b   :  { %v1144_v42 = vmul.f32 %v1140_v63, %v1140_v63 }
 0x19c   :  { %v613_v56 = vpop.permute.xlu0 %612 }
 0x19d   :  { %v623_v26 = vadd.f32 %v613_v56, %v1981_v4  ;;  %v659_v4 = vmul.f32 -0.39999992, %v1713_v3  ;;  %v1182_v56 = vadd.f32 %v1181_v28, %v1180_v30 }
 0x19f   :  { %v643_v17 = vadd.f32 %v633_v35, %v623_v26  ;;  %v674_v38 = vrot.slane %v659_v4, 1  ;;  %v646_v35 = vmul.f32 %v642_v36, %v642_v36  ;;  %v723_v55 = vrot.slane %v659_v4, 3 }
 0x1a0   :  { %v1184_v31 = vadd.f32 %v1183_v21, %v1182_v56 }
 0x1a1   :  { %v647_v8 = vmul.f32 %v643_v17, %v643_v17  ;;  %v675_v18 = vsel %vm313_vm3, %v672_v60, %v674_v38  ;;  %v724_v22 = vsel %vm344_vm4, %v721_v54, %v723_v55 }
 0x1a2   :  { %v683_v53 = vadd.f32 %v675_v18, %v1922_v2  ;;  %v1186_v23 = vadd.f32 %v1185_v49, %v1184_v31 }
 0x1a3   :  { %v1148_v51 = vadd.f32 %v1144_v42, %v647_v8  ;;  %v1101_v8 = vadd.f32 %v2038_v0, %v1965_v33 }
 0x1a4   :  { %v714_v26 = vadd.f32 %v706_v34, %v683_v53  ;;  %1187 = vadd.xlane.f32.xlu1 %v1186_v23 }
 0x1a5   :  { %v1156_v27 = vmul.f32 %v1152_v37, %v1148_v51 }
 0x1a6   :  { %v732_v16 = vadd.f32 %v724_v22, %v714_v26 }
 0x1a7   :  { %v1161_v50 = vsel %vm1159_vm7, %v1156_v27, 0.0 }
 0x1a8   :  { %v758_v14 = vadd.f32 %v750_v6, %v732_v16 }
 0x1aa   :  { %v1102_v11 = vadd.f32 %v2035_v25, %v758_v14 }
 0x1ad   :  { %v615_v20 = vpop.permute.xlu0 %614 }
 0x1ae   :  { %v1128_v41 = vpop.permute.xlu1 %1127  ;;  %v624_v47 = vadd.f32 %v615_v20, %v2003_v29 }
 0x1af   :  { %v1139_v48 = vadd.f32 %v1128_v41, %v1099_v61 }
 0x1b0   :  { %v644_v2 = vadd.f32 %v2050_v9, %v624_v47 }
 0x1b1   :  { %v1143_v32 = vmul.f32 %v1139_v48, %v1139_v48 }
 0x1b2   :  { %v648_v36 = vmul.f32 %v644_v2, %v644_v2 }
 0x1b3   :  { %v1147_v12 = vadd.f32 %v1143_v32, %v646_v35 }
 0x1b5   :  { %v1155_v44 = vmul.f32 %v1151_v39, %v1147_v12 }
 0x1b6   :  { %v637_v63 = vpop.permute.xlu1 %636 }
 0x1b7   :  { %v1160_v7 = vsel %vm1159_vm7, %v1155_v44, 0.0 }
 0x1b8   :  { %v1162_v60 = vadd.f32 %v1161_v50, %v1160_v7 }
 0x1c1   :  { %v1134_v57 = vpop.permute.xlu2 %1133 }
 0x1c2   :  { %v1142_v17 = vadd.f32 %v1134_v57, %v1102_v11 }
 0x1c4   :  { %v1146_v1 = vmul.f32 %v1142_v17, %v1142_v17 }
 0x1c7   :  { %v617_v3 = vpop.permute.xlu0 %616 }
 0x1c8   :  { %v625_v5 = vadd.f32 %v617_v3, %v2011_v40 }
 0x1ca   :  { %v645_v54 = vadd.f32 %v637_v63, %v625_v5 }
 0x1cc   :  { %v649_v24 = vmul.f32 %v645_v54, %v645_v54 }
 0x1ce   :  { %v1150_v10 = vadd.f32 %v1146_v1, %v649_v24 }
 0x1cf   :  { %v1132_v4 = vpop.permute.xlu0 %1131 }
 0x1d0   :  { %v1141_v61 = vadd.f32 %v1132_v4, %v1101_v8  ;;  %v1158_v51 = vmul.f32 %v1154_v13, %v1150_v10 }
 0x1d2   :  { %v1145_v25 = vmul.f32 %v1141_v61, %v1141_v61  ;;  %v1165_v29 = vsel %vm1159_vm7, %v1158_v51, 0.0 }
 0x1d4   :  { %v1149_v42 = vadd.f32 %v1145_v25, %v648_v36 }
 0x1d6   :  { %v1157_v41 = vmul.f32 %v1153_v59, %v1149_v42 }
 0x1d8   :  { %v1163_v40 = vsel %vm1159_vm7, %v1157_v41, 0.0 }
 0x1d9   :  { %v1164_v48 = vadd.f32 %v1163_v40, %v1162_v60 }
 0x1db   :  { %v1166_v37 = vadd.f32 %v1165_v29, %v1164_v48 }
 0x1dd   :  { %1167 = vadd.xlane.f32.xlu0 %v1166_v37 }
 0x217   :  { %v1188_v38 = vpop.xlane.xlu1 %1187 }
 0x218   :  { %v1189_v19 = vrot.slane %v1188_v38, 4 }
 0x21a   :  { %v1190_v33 = vadd.f32 %v1189_v19, %v1188_v38 }
 0x21c   :  { %v1191_v0 = vrot.slane %v1190_v33, 2 }
 0x21e   :  { %v1192_v39 = vadd.f32 %v1191_v0, %v1190_v33 }
 0x220   :  { %v1193_v12 = vrot.slane %v1192_v39, 1 }
 0x222   :  { %v1194_v15 = vadd.f32 %v1193_v12, %v1192_v39 }
 0x250   :  { %v1168_v9 = vpop.xlane.xlu0 %1167 }
 0x251   :  { %v1169_v35 = vrot.slane %v1168_v9, 4 }
 0x253   :  { %v1170_v32 = vadd.f32 %v1169_v35, %v1168_v9 }
 0x255   :  { %v1171_v27 = vrot.slane %v1170_v32, 2 }
 0x257   :  { %v1172_v62 = vadd.f32 %v1171_v27, %v1170_v32 }
 0x259   :  { %v1173_v59 = vrot.slane %v1172_v62, 1 }
 0x25b   :  { %v1174_v18 = vadd.f32 %v1173_v59, %v1172_v62 }
 0x25d   :  { %1218 = vpush %v1174_v18 }
 0x25e   :  { %1220 = vpush %v1194_v15 }
 0x28e   :  { %s1219_s7 = spop %1218 }
 0x28f   :  { %1198 = sst [smem:[#allocation8]] %s1219_s7  ;;  %s1221_s8 = spop %1220 }
 0x290   :  { %s1196_s9 = smul.f32 2.0, %s1221_s8 }
 0x292   :  { %1200 = sst [smem:[#allocation8 + $0x1]] %s1196_s9 }
 0x293   :  { %1209 = dma.smem_to_hbm %s1351_s10, 16, %s1207_s6, [#allocation4]  }
 0x294   :  { %1337 = dma.done.wait [#allocation4], 16  }
 0x295   :  { %1338 = vsyncadd [#allocation4], 4294967280 }
 0x296   :  { %1214 = sfence }
 0x297   :  { %1215 = vsyncpa [#allocation3], 1 }
 0x298   :  { %1216 = vsyncpa [#allocation6], 1 }
 0x299   :  { %1217 = vsyncpa [#allocation4], 1 }

</bundles_post_ra>
